<compile_context>
chip_gen: v6e
topology: v6e:2x2x1
jax: 0.10.0
libtpu: 0.0.40
codegen_flags: <defaults>
</compile_context>

<pallas_src>
import functools

import jax
import jax.numpy as jnp
from jax import lax
from jax.experimental import pallas as pl
from jax.experimental.pallas import tpu as pltpu


def _round_up(x, m):
    return (x + m - 1) // m * m


def _vmem_capacity_bytes():
    """Physical VMEM of the current generation (conservative fallback: v7x 64 MiB)."""
    try:
        return int(pltpu.get_tpu_info().vmem_capacity_bytes)
    except Exception:
        return 64 * 1024 * 1024


def _tile_vmem_bytes(P, C_in, C_out, Ht, Wq, in_item, out_item):
    """Estimated VMEM working set of one grid step (inputs/outputs double-buffered)."""
    x_blk = _round_up(P, 8) * _round_up(C_in, 128) * in_item          # full padded image
    w_blk = 9 * _round_up(C_out, 8) * _round_up(C_in, 128) * in_item  # per-tap weights
    b_blk = _round_up(C_out, 8) * 128 * 4                             # bias
    o_blk = _round_up(C_out, 8) * _round_up(Ht * Wq, 128) * out_item  # output row block
    acc = _round_up(C_out, 8) * _round_up(Ht * Wq, 128) * 4           # f32 accumulator
    return 2 * (x_blk + w_blk + b_blk + o_blk) + acc


def _pick_row_tile(H, Wq, ws_fn, budget):
    """Largest row tile whose working set fits the budget.

    Ht must either equal H (block == full array last dim) or make Ht*Wq a
    multiple of 128 so the output block stays lane-aligned.
    """
    divisors = [d for d in range(H, 0, -1) if H % d == 0]
    legal = [d for d in divisors if d == H or (d * Wq) % 128 == 0]
    for d in legal:
        if ws_fn(d) <= budget:
            return d
    # TODO(synk): feature maps whose padded image exceeds the VMEM budget need a
    # manual make_async_copy halo pipeline (memory_space=pl.ANY); not needed here.
    return legal[-1]


def _conv3x3_kernel(x_ref, w_ref, b_ref, o_ref, *, Ht, Wq, n_blocks):
    """One (batch, row-block) grid step.

    x_ref: ((H+3)*Wq, C_in)  zero-padded image for this batch element,
                             position-major / channel-minor (resident across r).
    w_ref: (9, C_out, C_in)  per-tap weights, tap t = kh*3 + kw (resident).
    b_ref: (C_out, 1)        f32 bias.
    o_ref: (C_out, Ht*Wq)    transposed output row block, row-major over
                             (Ht, Wq); the right-most 2 columns of each row are
                             overcompute and are dropped by the wrapper.
    """
    c_out = o_ref.shape[0]
    m = Ht * Wq
    base = 0 if n_blocks == 1 else pl.program_id(1) * m

    acc = jnp.zeros((c_out, m), jnp.float32)
    for kh in range(3):
        for kw in range(3):
            tap = kh * 3 + kw
            # All Ht*Wq output positions of this row block, shifted by (kh, kw):
            # one contiguous sublane window — no im2col reshape/concat relayout.
            slab = x_ref[pl.ds(base + kh * Wq + kw, m), :]          # (m, C_in)
            acc = acc + lax.dot_general(
                w_ref[tap], slab,
                dimension_numbers=(((1,), (1,)), ((), ())),         # contract C_in
                preferred_element_type=jnp.float32)
    o_ref[...] = (acc + b_ref[...]).astype(o_ref.dtype)


def bbox_prediction_layer(x_nchw, w_oihw, bias, *, compute_dtype=None, out_dtype=None):
    """Equivalent of BBoxPredictionLayer.forward (3x3 conv, stride 1, padding 1).

    x_nchw: (N, C_in, H, W)   w_oihw: (C_out, C_in, 3, 3)   bias: (C_out,)
    returns (N, C_out, H, W)
    """
    N, C_in, H, W = x_nchw.shape
    C_out = w_oihw.shape[0]
    Wq = W + 2                      # padded row width (also the overcompute width)
    P = (H + 3) * Wq                # padded rows: 1 top + 2 bottom (overcompute guard)

    cd = x_nchw.dtype if compute_dtype is None else jnp.dtype(compute_dtype)
    od = x_nchw.dtype if out_dtype is None else jnp.dtype(out_dtype)

    # ---- tiling sized to the generation's VMEM (v7x: 64 MiB, v5e/v6e: 128 MiB) ----
    cap = _vmem_capacity_bytes()
    budget = int(0.45 * cap)        # leave room for double-buffering + headroom
    ws = lambda ht: _tile_vmem_bytes(P, C_in, C_out, ht, Wq,
                                     jnp.dtype(cd).itemsize, jnp.dtype(od).itemsize)
    Ht = _pick_row_tile(H, Wq, ws, budget)
    n_blocks = H // Ht
    vmem_limit = int(min(0.9 * cap, max(2 * ws(Ht), 32 << 20)))

    # ---- layout glue (single fused XLA pass): NCHW -> padded channel-minor ----
    x_nhwc = jnp.transpose(x_nchw, (0, 2, 3, 1)).astype(cd)
    x_pad = jnp.pad(x_nhwc, ((0, 0), (1, 2), (1, 1), (0, 0)))        # (N, H+3, Wq, C_in)
    x_flat = x_pad.reshape(N, P, C_in)                               # position-major

    w_taps = jnp.transpose(w_oihw, (2, 3, 0, 1)).reshape(9, C_out, C_in).astype(cd)
    b2 = bias.astype(jnp.float32).reshape(C_out, 1)

    kernel = functools.partial(_conv3x3_kernel, Ht=Ht, Wq=Wq, n_blocks=n_blocks)

    out_flat = pl.pallas_call(
        kernel,
        out_shape=jax.ShapeDtypeStruct((N, C_out, H * Wq), od),
        grid=(N, n_blocks),
        in_specs=[
            # Full padded image per batch element; constant along r => resident,
            # not re-DMA'd per row block (no wrapper-side halo gather needed).
            pl.BlockSpec((None, P, C_in), lambda n, r: (n, 0, 0)),
            # Weights / bias resident for the whole grid.
            pl.BlockSpec((9, C_out, C_in), lambda n, r: (0, 0, 0)),
            pl.BlockSpec((C_out, 1), lambda n, r: (0, 0)),
        ],
        # Transposed, unpadded output: only the real C_out channels are written.
        out_specs=pl.BlockSpec((None, C_out, Ht * Wq), lambda n, r: (n, 0, r)),
        compiler_params=pltpu.CompilerParams(
            dimension_semantics=("parallel", "parallel"),
            vmem_limit_bytes=vmem_limit,
        ),
    )(x_flat, w_taps, b2)

    # Free reshape + cheap slice dropping the 2 overcompute columns per row.
    return out_flat.reshape(N, C_out, H, Wq)[:, :, :, :W]


def _reference_conv(x_nchw, w_oihw, bias):
    out = lax.conv_general_dilated(
        x_nchw, w_oihw,
        window_strides=(1, 1),
        padding=((1, 1), (1, 1)),
        dimension_numbers=("NCHW", "OIHW", "NCHW"),
        precision=lax.Precision.HIGHEST,
    )
    return out + bias.reshape(1, -1, 1, 1)


if __name__ == "__main__":
    # Shapes consistent with the module: batch=2, num_inputs=4, spatial=16x16,
    # num_anchors=3 -> C_out = num_anchors*4 = 12.
    N, C_in, H, W = 2, 4, 16, 16
    num_anchors = 3
    C_out = num_anchors * 4

    key = jax.random.PRNGKey(0)
    kx, kw, kb = jax.random.split(key, 3)
    x = jax.random.normal(kx, (N, C_in, H, W), dtype=jnp.float32)
    w = jax.random.normal(kw, (C_out, C_in, 3, 3), dtype=jnp.float32) * 0.1
    b = jax.random.normal(kb, (C_out,), dtype=jnp.float32) * 0.1

    fwd = jax.jit(bbox_prediction_layer)
    out = jax.block_until_ready(fwd(x, w, b))
    ref = jax.block_until_ready(_reference_conv(x, w, b))

    assert out.shape == (N, C_out, H, W), out.shape
    err = float(jnp.max(jnp.abs(out - ref)))
    assert err < 5e-4, err

    print("KERNEL_OK")
</pallas_src>

<mosaic_0001>
module attributes {stable_mosaic.version = 11 : i64} {
  func.func @_conv3x3_kernel(%arg0: i32, %arg1: i32, %arg2: memref<1x342x4xf32, #tpu.memory_space<vmem>>, %arg3: memref<9x12x4xf32, #tpu.memory_space<vmem>>, %arg4: memref<12x1xf32, #tpu.memory_space<vmem>>, %arg5: memref<1x12x288xf32, #tpu.memory_space<vmem>>) attributes {dimension_semantics = [#tpu.dimension_semantics<parallel>, #tpu.dimension_semantics<parallel>], iteration_bounds = array<i64: 2, 1>, scalar_prefetch = 0 : i64, scratch_operands = 0 : i64, tpu.core_type = #tpu.core_type<tc>, window_params = [{transform_indices = @transform_0, window_bounds = array<i64: 1, 342, 4>}, {pipeline_mode = #tpu.pipeline_mode<synchronous>, transform_indices = @transform_1, window_bounds = array<i64: 9, 12, 4>}, {pipeline_mode = #tpu.pipeline_mode<synchronous>, transform_indices = @transform_2, window_bounds = array<i64: 12, 1>}, {transform_indices = @transform_3, window_bounds = array<i64: 1, 12, 288>}]} {
    %cst = arith.constant 0.000000e+00 : f32
    %0 = vector.broadcast %cst : f32 to vector<12x288xf32>
    %c0 = arith.constant 0 : index
    %c0_0 = arith.constant 0 : index
    %c0_1 = arith.constant 0 : index
    %1 = vector.load %arg2[%c0, %c0_0, %c0_1] : memref<1x342x4xf32, #tpu.memory_space<vmem>>, vector<1x288x4xf32>
    %2 = vector.shape_cast %1 : vector<1x288x4xf32> to vector<288x4xf32>
    %c0_2 = arith.constant 0 : index
    %c0_3 = arith.constant 0 : index
    %c0_4 = arith.constant 0 : index
    %3 = vector.load %arg3[%c0_2, %c0_3, %c0_4] : memref<9x12x4xf32, #tpu.memory_space<vmem>>, vector<1x12x4xf32>
    %4 = vector.shape_cast %3 : vector<1x12x4xf32> to vector<12x4xf32>
    %cst_5 = arith.constant dense<0.000000e+00> : vector<12x288xf32>
    %5 = tpu.matmul %4, %2, %cst_5 {dimension_numbers = #tpu.dot_dimension_numbers<[1], [1], [0], [0], [0, 0, 1, 0], [], []>} : vector<12x4xf32>, vector<288x4xf32>, vector<12x288xf32> -> vector<12x288xf32>
    %6 = arith.addf %0, %5 : vector<12x288xf32>
    %c0_6 = arith.constant 0 : index
    %c1 = arith.constant 1 : index
    %c0_7 = arith.constant 0 : index
    %7 = vector.load %arg2[%c0_6, %c1, %c0_7] : memref<1x342x4xf32, #tpu.memory_space<vmem>>, vector<1x288x4xf32>
    %8 = vector.shape_cast %7 : vector<1x288x4xf32> to vector<288x4xf32>
    %c1_8 = arith.constant 1 : index
    %c0_9 = arith.constant 0 : index
    %c0_10 = arith.constant 0 : index
    %9 = vector.load %arg3[%c1_8, %c0_9, %c0_10] : memref<9x12x4xf32, #tpu.memory_space<vmem>>, vector<1x12x4xf32>
    %10 = vector.shape_cast %9 : vector<1x12x4xf32> to vector<12x4xf32>
    %cst_11 = arith.constant dense<0.000000e+00> : vector<12x288xf32>
    %11 = tpu.matmul %10, %8, %cst_11 {dimension_numbers = #tpu.dot_dimension_numbers<[1], [1], [0], [0], [0, 0, 1, 0], [], []>} : vector<12x4xf32>, vector<288x4xf32>, vector<12x288xf32> -> vector<12x288xf32>
    %12 = arith.addf %6, %11 : vector<12x288xf32>
    %c0_12 = arith.constant 0 : index
    %c2 = arith.constant 2 : index
    %c0_13 = arith.constant 0 : index
    %13 = vector.load %arg2[%c0_12, %c2, %c0_13] : memref<1x342x4xf32, #tpu.memory_space<vmem>>, vector<1x288x4xf32>
    %14 = vector.shape_cast %13 : vector<1x288x4xf32> to vector<288x4xf32>
    %c2_14 = arith.constant 2 : index
    %c0_15 = arith.constant 0 : index
    %c0_16 = arith.constant 0 : index
    %15 = vector.load %arg3[%c2_14, %c0_15, %c0_16] : memref<9x12x4xf32, #tpu.memory_space<vmem>>, vector<1x12x4xf32>
    %16 = vector.shape_cast %15 : vector<1x12x4xf32> to vector<12x4xf32>
    %cst_17 = arith.constant dense<0.000000e+00> : vector<12x288xf32>
    %17 = tpu.matmul %16, %14, %cst_17 {dimension_numbers = #tpu.dot_dimension_numbers<[1], [1], [0], [0], [0, 0, 1, 0], [], []>} : vector<12x4xf32>, vector<288x4xf32>, vector<12x288xf32> -> vector<12x288xf32>
    %18 = arith.addf %12, %17 : vector<12x288xf32>
    %c0_18 = arith.constant 0 : index
    %c18 = arith.constant 18 : index
    %c0_19 = arith.constant 0 : index
    %19 = vector.load %arg2[%c0_18, %c18, %c0_19] : memref<1x342x4xf32, #tpu.memory_space<vmem>>, vector<1x288x4xf32>
    %20 = vector.shape_cast %19 : vector<1x288x4xf32> to vector<288x4xf32>
    %c3 = arith.constant 3 : index
    %c0_20 = arith.constant 0 : index
    %c0_21 = arith.constant 0 : index
    %21 = vector.load %arg3[%c3, %c0_20, %c0_21] : memref<9x12x4xf32, #tpu.memory_space<vmem>>, vector<1x12x4xf32>
    %22 = vector.shape_cast %21 : vector<1x12x4xf32> to vector<12x4xf32>
    %cst_22 = arith.constant dense<0.000000e+00> : vector<12x288xf32>
    %23 = tpu.matmul %22, %20, %cst_22 {dimension_numbers = #tpu.dot_dimension_numbers<[1], [1], [0], [0], [0, 0, 1, 0], [], []>} : vector<12x4xf32>, vector<288x4xf32>, vector<12x288xf32> -> vector<12x288xf32>
    %24 = arith.addf %18, %23 : vector<12x288xf32>
    %c0_23 = arith.constant 0 : index
    %c19 = arith.constant 19 : index
    %c0_24 = arith.constant 0 : index
    %25 = vector.load %arg2[%c0_23, %c19, %c0_24] : memref<1x342x4xf32, #tpu.memory_space<vmem>>, vector<1x288x4xf32>
    %26 = vector.shape_cast %25 : vector<1x288x4xf32> to vector<288x4xf32>
    %c4 = arith.constant 4 : index
    %c0_25 = arith.constant 0 : index
    %c0_26 = arith.constant 0 : index
    %27 = vector.load %arg3[%c4, %c0_25, %c0_26] : memref<9x12x4xf32, #tpu.memory_space<vmem>>, vector<1x12x4xf32>
    %28 = vector.shape_cast %27 : vector<1x12x4xf32> to vector<12x4xf32>
    %cst_27 = arith.constant dense<0.000000e+00> : vector<12x288xf32>
    %29 = tpu.matmul %28, %26, %cst_27 {dimension_numbers = #tpu.dot_dimension_numbers<[1], [1], [0], [0], [0, 0, 1, 0], [], []>} : vector<12x4xf32>, vector<288x4xf32>, vector<12x288xf32> -> vector<12x288xf32>
    %30 = arith.addf %24, %29 : vector<12x288xf32>
    %c0_28 = arith.constant 0 : index
    %c20 = arith.constant 20 : index
    %c0_29 = arith.constant 0 : index
    %31 = vector.load %arg2[%c0_28, %c20, %c0_29] : memref<1x342x4xf32, #tpu.memory_space<vmem>>, vector<1x288x4xf32>
    %32 = vector.shape_cast %31 : vector<1x288x4xf32> to vector<288x4xf32>
    %c5 = arith.constant 5 : index
    %c0_30 = arith.constant 0 : index
    %c0_31 = arith.constant 0 : index
    %33 = vector.load %arg3[%c5, %c0_30, %c0_31] : memref<9x12x4xf32, #tpu.memory_space<vmem>>, vector<1x12x4xf32>
    %34 = vector.shape_cast %33 : vector<1x12x4xf32> to vector<12x4xf32>
    %cst_32 = arith.constant dense<0.000000e+00> : vector<12x288xf32>
    %35 = tpu.matmul %34, %32, %cst_32 {dimension_numbers = #tpu.dot_dimension_numbers<[1], [1], [0], [0], [0, 0, 1, 0], [], []>} : vector<12x4xf32>, vector<288x4xf32>, vector<12x288xf32> -> vector<12x288xf32>
    %36 = arith.addf %30, %35 : vector<12x288xf32>
    %c0_33 = arith.constant 0 : index
    %c36 = arith.constant 36 : index
    %c0_34 = arith.constant 0 : index
    %37 = vector.load %arg2[%c0_33, %c36, %c0_34] : memref<1x342x4xf32, #tpu.memory_space<vmem>>, vector<1x288x4xf32>
    %38 = vector.shape_cast %37 : vector<1x288x4xf32> to vector<288x4xf32>
    %c6 = arith.constant 6 : index
    %c0_35 = arith.constant 0 : index
    %c0_36 = arith.constant 0 : index
    %39 = vector.load %arg3[%c6, %c0_35, %c0_36] : memref<9x12x4xf32, #tpu.memory_space<vmem>>, vector<1x12x4xf32>
    %40 = vector.shape_cast %39 : vector<1x12x4xf32> to vector<12x4xf32>
    %cst_37 = arith.constant dense<0.000000e+00> : vector<12x288xf32>
    %41 = tpu.matmul %40, %38, %cst_37 {dimension_numbers = #tpu.dot_dimension_numbers<[1], [1], [0], [0], [0, 0, 1, 0], [], []>} : vector<12x4xf32>, vector<288x4xf32>, vector<12x288xf32> -> vector<12x288xf32>
    %42 = arith.addf %36, %41 : vector<12x288xf32>
    %c0_38 = arith.constant 0 : index
    %c37 = arith.constant 37 : index
    %c0_39 = arith.constant 0 : index
    %43 = vector.load %arg2[%c0_38, %c37, %c0_39] : memref<1x342x4xf32, #tpu.memory_space<vmem>>, vector<1x288x4xf32>
    %44 = vector.shape_cast %43 : vector<1x288x4xf32> to vector<288x4xf32>
    %c7 = arith.constant 7 : index
    %c0_40 = arith.constant 0 : index
    %c0_41 = arith.constant 0 : index
    %45 = vector.load %arg3[%c7, %c0_40, %c0_41] : memref<9x12x4xf32, #tpu.memory_space<vmem>>, vector<1x12x4xf32>
    %46 = vector.shape_cast %45 : vector<1x12x4xf32> to vector<12x4xf32>
    %cst_42 = arith.constant dense<0.000000e+00> : vector<12x288xf32>
    %47 = tpu.matmul %46, %44, %cst_42 {dimension_numbers = #tpu.dot_dimension_numbers<[1], [1], [0], [0], [0, 0, 1, 0], [], []>} : vector<12x4xf32>, vector<288x4xf32>, vector<12x288xf32> -> vector<12x288xf32>
    %48 = arith.addf %42, %47 : vector<12x288xf32>
    %c0_43 = arith.constant 0 : index
    %c38 = arith.constant 38 : index
    %c0_44 = arith.constant 0 : index
    %49 = vector.load %arg2[%c0_43, %c38, %c0_44] : memref<1x342x4xf32, #tpu.memory_space<vmem>>, vector<1x288x4xf32>
    %50 = vector.shape_cast %49 : vector<1x288x4xf32> to vector<288x4xf32>
    %c8 = arith.constant 8 : index
    %c0_45 = arith.constant 0 : index
    %c0_46 = arith.constant 0 : index
    %51 = vector.load %arg3[%c8, %c0_45, %c0_46] : memref<9x12x4xf32, #tpu.memory_space<vmem>>, vector<1x12x4xf32>
    %52 = vector.shape_cast %51 : vector<1x12x4xf32> to vector<12x4xf32>
    %cst_47 = arith.constant dense<0.000000e+00> : vector<12x288xf32>
    %53 = tpu.matmul %52, %50, %cst_47 {dimension_numbers = #tpu.dot_dimension_numbers<[1], [1], [0], [0], [0, 0, 1, 0], [], []>} : vector<12x4xf32>, vector<288x4xf32>, vector<12x288xf32> -> vector<12x288xf32>
    %54 = arith.addf %48, %53 : vector<12x288xf32>
    %c0_48 = arith.constant 0 : index
    %c0_49 = arith.constant 0 : index
    %55 = vector.load %arg4[%c0_48, %c0_49] : memref<12x1xf32, #tpu.memory_space<vmem>>, vector<12x1xf32>
    %56 = vector.broadcast %55 : vector<12x1xf32> to vector<12x288xf32>
    %57 = arith.addf %54, %56 : vector<12x288xf32>
    %c0_50 = arith.constant 0 : index
    %c0_51 = arith.constant 0 : index
    %c0_52 = arith.constant 0 : index
    %58 = vector.load %arg5[%c0_50, %c0_51, %c0_52] : memref<1x12x288xf32, #tpu.memory_space<vmem>>, vector<1x12x288xf32>
    %59 = vector.shape_cast %58 : vector<1x12x288xf32> to vector<12x288xf32>
    %60 = vector.shape_cast %57 : vector<12x288xf32> to vector<1x12x288xf32>
    tpu.vector_store %arg5[%c0_50, %c0_51, %c0_52], %60 {strides = array<i32>} : memref<1x12x288xf32, #tpu.memory_space<vmem>>, vector<1x12x288xf32>,
    return
  }
  func.func @transform_0(%arg0: i32, %arg1: i32) -> (i32, i32, i32) {
    %c0_i32 = arith.constant 0 : i32
    %c0_i32_0 = arith.constant 0 : i32
    %c0_i32_1 = arith.constant 0 : i32
    return %arg0, %c0_i32, %c0_i32_0 : i32, i32, i32
  }
  func.func @transform_1(%arg0: i32, %arg1: i32) -> (i32, i32, i32) {
    %c0_i32 = arith.constant 0 : i32
    %c0_i32_0 = arith.constant 0 : i32
    %c0_i32_1 = arith.constant 0 : i32
    %c0_i32_2 = arith.constant 0 : i32
    return %c0_i32, %c0_i32_0, %c0_i32_1 : i32, i32, i32
  }
  func.func @transform_2(%arg0: i32, %arg1: i32) -> (i32, i32) {
    %c0_i32 = arith.constant 0 : i32
    %c0_i32_0 = arith.constant 0 : i32
    %c0_i32_1 = arith.constant 0 : i32
    return %c0_i32, %c0_i32_0 : i32, i32
  }
  func.func @transform_3(%arg0: i32, %arg1: i32) -> (i32, i32, i32) {
    %c0_i32 = arith.constant 0 : i32
    %c0_i32_0 = arith.constant 0 : i32
    return %arg0, %c0_i32, %arg1 : i32, i32, i32
  }
}

</mosaic_0001>

<bundles_post_ra>
// kernel: bbox_prediction_layer.1
= control target key start
LH: loop header
LB: loop body
LE: loop exit
PB: predicated region body
PF: predicated region fallthrough
CT: control target
= control target key end

     0   :  { %s4023_s12 = smov 0   ;;  %s4025_s13 = smov 0   ;;  %s5013_s0 = inlined_call_operand.vmem [shape: f32[2,342,4], index: 0, kind: input, shape index: {}]   ;;  %s5014_s1 = inlined_call_operand.vmem [shape: f32[9,12,4], index: 1, kind: input, shape index: {}]   ;;  %s5015_s2 = inlined_call_operand.vmem [shape: f32[12,1], index: 2, kind: input, shape index: {}]   ;;  %s5016_s3 = inlined_call_operand.vmem [shape: f32[2,12,288], index: 3, kind: output, shape index: {}]  }
   0x1   :  { %s4027_s14 = smov 0  }
   0x2 LB: > { %s25_s15 = sadd.s32 1, %s3996_s13  ;;  %p3092_p0 = scmp.ge.s32.totalorder %s4000_s14, 1  ;;  %s4000_s14 = sphi %s4027_s14, %s13_s14   ;;  %s3996_s13 = sphi %s4025_s13, %s5018_s13   ;;  %s3992_s12 = sphi %s4023_s12, %s5017_s12  }
   0x3   : > { %p27_p1 = scmp.ge.s32.totalorder %s25_s15, 2  ;;  %p151_p2 = scmp.lt.s32.totalorder %s4000_s14, 3 }
   0x5   : > { %s5020_s15 = smov (%p27_p1, %s25_s15), 0  ;;  %p152_p3 = pnand %p3092_p0, %p151_p2 }
   0x6   : > { %p179_p4 = scmp.lt.s32.totalorder (!%p152_p3), %s3992_s12, 1 }
   0x7   : > { %155 = sbr.rel (%p152_p3) target bundleno = 586 (0x24a), region = 32 }
   0xc   : > { %vm271_vm0 = vcmask 31744   ;;  %v4044_v0 = vld [vmem:[%s5014_s1 + $0x10] sm:$0xff]  ;;  %s5022_s12 = smov (!%p179_p4, %s3992_s12), 1  ;;  %v4091_v15 = vld [vmem:[%s5014_s1 + $0x18] sm:$0xf]  ;;  %v4104_v20 = vld [vmem:[%s5014_s1] sm:$0xff] }
   0xd   : > { %3859 = vmatprep.mubr.msk.f32.mxu1 %vm271_vm0, %v4044_v0  ;;  %3505 = vmatprep.mubr.msk.f32.mxu0 %vm271_vm0, %v4044_v0  ;;  %s3950_s18 = smul.u32 344, %s5022_s12  ;;  %vm3005_vm1 = vcmask 257024   ;;  %vm3001_vm2 = vcmask 261120  }
   0xf   : > { %s4056_s21 = scalar_lea.vmem %s5013_s0, %s3950_s18 }
  0x10   : > { %v263_v1 = vld [vmem:[%s4056_s21 + $0xf9] sm:$0xff]  ;;  %v262_v4 = vld [vmem:[%s4056_s21 + $0xf1] sm:$0xff]  ;;  %v261_v7 = vld [vmem:[%s4056_s21 + $0xe9] sm:$0xff] }
  0x11   : > { %v267_v2 = vld [vmem:[%s4056_s21 + $0x119] sm:$0xff]  ;;  %3473 = vmatprep.subr.msk.mxu0 %vm271_vm0, %v263_v1  ;;  %v266_v5 = vld [vmem:[%s4056_s21 + $0x111] sm:$0xff]  ;;  %v265_v8 = vld [vmem:[%s4056_s21 + $0x109] sm:$0xff] }
  0x12   : > { %v247_v3 = vld [vmem:[%s4056_s21 + $0x79] sm:$0xff]  ;;  %3851 = vmatprep.subr.msk.mxu1 %vm271_vm0, %v267_v2  ;;  %v246_v6 = vld [vmem:[%s4056_s21 + $0x71] sm:$0xff]  ;;  %v245_v9 = vld [vmem:[%s4056_s21 + $0x69] sm:$0xff] }
  0x13   : > { %3474 = vmatpush3.xpose.msk.msra.mxu0 %vm271_vm0, %v247_v3  ;;  %3852 = vmatpush3.xpose.msk.msra.mxu1 %vm271_vm0, %v267_v2  ;;  %v260_v10 = vld [vmem:[%s4056_s21 + $0xe1] sm:$0xff]  ;;  %v259_v13 = vld [vmem:[%s4056_s21 + $0xd9] sm:$0xff]  ;;  %v258_v18 = vld [vmem:[%s4056_s21 + $0xd1] sm:$0xff] }
  0x14   : > { %3475 = vmatprep.subr.msk.mxu0 %vm271_vm0, %v262_v4  ;;  %3853 = vmatprep.subr.msk.mxu1 %vm271_vm0, %v266_v5  ;;  %v264_v11 = vld [vmem:[%s4056_s21 + $0x101] sm:$0xff]  ;;  %v225_v14 = vld [vmem:[%s4056_s21 + $0xf8] sm:$0xff]  ;;  %v224_v19 = vld [vmem:[%s4056_s21 + $0xf0] sm:$0xff] }
  0x15   : > { %v244_v12 = vld [vmem:[%s4056_s21 + $0x61] sm:$0xff]  ;;  %v243_v16 = vld [vmem:[%s4056_s21 + $0x59] sm:$0xff]  ;;  %v242_v21 = vld [vmem:[%s4056_s21 + $0x51] sm:$0xff] }
  0x16   : > { %v209_v17 = vld [vmem:[%s4056_s21 + $0x78] sm:$0xff]  ;;  %v208_v22 = vld [vmem:[%s4056_s21 + $0x70] sm:$0xff]  ;;  %v223_v24 = vld [vmem:[%s4056_s21 + $0xe8] sm:$0xff] }
  0x17   : > { %3476 = vmatpush3.xpose.msk.msra.mxu0 %vm271_vm0, %v246_v6  ;;  %3854 = vmatpush3.xpose.msk.msra.mxu1 %vm271_vm0, %v266_v5  ;;  %v257_v23 = vld [vmem:[%s4056_s21 + $0xc9] sm:$0xff]  ;;  %v256_v27 = vld [vmem:[%s4056_s21 + $0xc1] sm:$0xff]  ;;  %v255_v31 = vld [vmem:[%s4056_s21 + $0xb9] sm:$0xff] }
  0x18   : > { %3477 = vmatprep.subr.msk.mxu0 %vm271_vm0, %v261_v7  ;;  %3855 = vmatprep.subr.msk.mxu1 %vm271_vm0, %v265_v8  ;;  %v241_v25 = vld [vmem:[%s4056_s21 + $0x49] sm:$0xff]  ;;  %v222_v28 = vld [vmem:[%s4056_s21 + $0xe0] sm:$0xff]  ;;  %v221_v32 = vld [vmem:[%s4056_s21 + $0xd8] sm:$0xff] }
  0x19   : > { %v207_v26 = vld [vmem:[%s4056_s21 + $0x68] sm:$0xff]  ;;  %v206_v30 = vld [vmem:[%s4056_s21 + $0x60] sm:$0xff]  ;;  %v205_v34 = vld [vmem:[%s4056_s21 + $0x58] sm:$0xff] }
  0x1a   : > { %v240_v29 = vld [vmem:[%s4056_s21 + $0x41] sm:$0xff]  ;;  %v239_v33 = vld [vmem:[%s4056_s21 + $0x39] sm:$0xff]  ;;  %v254_v35 = vld [vmem:[%s4056_s21 + $0xb1] sm:$0xff] }
  0x1b   : > { %3478 = vmatpush3.xpose.msk.msra.mxu0 %vm271_vm0, %v245_v9  ;;  %3856 = vmatpush3.xpose.msk.msra.mxu1 %vm271_vm0, %v265_v8  ;;  %v220_v36 = vld [vmem:[%s4056_s21 + $0xd0] sm:$0xff]  ;;  %v219_v40 = vld [vmem:[%s4056_s21 + $0xc8] sm:$0xff]  ;;  %v218_v44 = vld [vmem:[%s4056_s21 + $0xc0] sm:$0xff] }
  0x1c   : > { %3479 = vmatprep.subr.msk.mxu0 %vm271_vm0, %v260_v10  ;;  %3857 = vmatprep.subr.msk.mxu1 %vm271_vm0, %v264_v11  ;;  %v238_v37 = vld [vmem:[%s4056_s21 + $0x31] sm:$0xff]  ;;  %v253_v39 = vld [vmem:[%s4056_s21 + $0xa9] sm:$0xff]  ;;  %v252_v43 = vld [vmem:[%s4056_s21 + $0xa1] sm:$0xff] }
  0x1d   : > { %v204_v38 = vld [vmem:[%s4056_s21 + $0x50] sm:$0xff]  ;;  %v203_v42 = vld [vmem:[%s4056_s21 + $0x48] sm:$0xff]  ;;  %v202_v46 = vld [vmem:[%s4056_s21 + $0x40] sm:$0xff] }
  0x1e   : > { %v237_v41 = vld [vmem:[%s4056_s21 + $0x29] sm:$0xff]  ;;  %v236_v45 = vld [vmem:[%s4056_s21 + $0x21] sm:$0xff]  ;;  %v251_v47 = vld [vmem:[%s4056_s21 + $0x99] sm:$0xff] }
  0x1f   : > { %3480 = vmatpush3.xpose.msk.msra.mxu0 %vm271_vm0, %v244_v12  ;;  %3858 = vmatpush3.xpose.msk.msra.mxu1 %vm271_vm0, %v264_v11  ;;  %v217_v48 = vld [vmem:[%s4056_s21 + $0xb8] sm:$0xff]  ;;  %v216_v52 = vld [vmem:[%s4056_s21 + $0xb0] sm:$0xff]  ;;  %v215_v56 = vld [vmem:[%s4056_s21 + $0xa8] sm:$0xff] }
  0x20   : > { %3481 = vmatprep.subr.msk.mxu0 %vm271_vm0, %v259_v13  ;;  %3515 = vmatprep.subr.msk.mxu1 %vm271_vm0, %v225_v14  ;;  %v235_v49 = vld [vmem:[%s4056_s21 + $0x19] sm:$0xff]  ;;  %v250_v51 = vld [vmem:[%s4056_s21 + $0x91] sm:$0xff]  ;;  %v249_v55 = vld [vmem:[%s4056_s21 + $0x89] sm:$0xff] }
  0x21   : > { %v201_v50 = vld [vmem:[%s4056_s21 + $0x38] sm:$0xff]  ;;  %v200_v54 = vld [vmem:[%s4056_s21 + $0x30] sm:$0xff]  ;;  %v199_v58 = vld [vmem:[%s4056_s21 + $0x28] sm:$0xff] }
  0x22   : > { %3860 = vmatmul.mubr.msk.f32.vlgmr.msra.gmra.mxu1 %vm271_vm0, %v4091_v15  ;;  %v234_v53 = vld [vmem:[%s4056_s21 + $0x11] sm:$0xff]  ;;  %v233_v57 = vld [vmem:[%s4056_s21 + $0x9] sm:$0xff]  ;;  %v248_v59 = vld [vmem:[%s4056_s21 + $0x81] sm:$0xff] }
  0x23   : > { %3482 = vmatpush3.xpose.msk.msra.mxu0 %vm271_vm0, %v243_v16  ;;  %3516 = vmatpush3.xpose.msk.msra.mxu1 %vm271_vm0, %v209_v17  ;;  %v214_v60 = vld [vmem:[%s4056_s21 + $0xa0] sm:$0xff]  ;;  %v213_v63 = vld [vmem:[%s4056_s21 + $0x98] sm:$0xff]  ;;  %v212_v4 = vld [vmem:[%s4056_s21 + $0x90] sm:$0xff] }
  0x24   : > { %3483 = vmatprep.subr.msk.mxu0 %vm271_vm0, %v258_v18  ;;  %3517 = vmatprep.subr.msk.mxu1 %vm271_vm0, %v224_v19  ;;  %v232_v61 = vld [vmem:[%s4056_s21 + $0x1] sm:$0xff]  ;;  %v197_v2 = vld [vmem:[%s4056_s21 + $0x18] sm:$0xff]  ;;  %v196_v6 = vld [vmem:[%s4056_s21 + $0x10] sm:$0xff] }
  0x25   : > { %3547 = vmatprep.mubr.msk.f32.mxu1 %vm271_vm0, %v4104_v20  ;;  %v198_v62 = vld [vmem:[%s4056_s21 + $0x20] sm:$0xff]  ;;  %v4209_v5 = vld [vmem:[%s4056_s21 + $0xf2] sm:$0xff]  ;;  %v211_v8 = vld [vmem:[%s4056_s21 + $0x88] sm:$0xff] }
  0x26   : > { %v4196_v1 = vld [vmem:[%s4056_s21 + $0xfa] sm:$0xff]  ;;  %v4221_v7 = vld [vmem:[%s4056_s21 + $0x72] sm:$0xff]  ;;  %v4225_v9 = vld [vmem:[%s4056_s21 + $0xea] sm:$0xff] }
  0x27   : > { %3484 = vmatpush3.xpose.msk.msra.mxu0 %vm271_vm0, %v242_v21  ;;  %3518 = vmatpush3.xpose.msk.msra.mxu1 %vm271_vm0, %v208_v22  ;;  %v4205_v3 = vld [vmem:[%s4056_s21 + $0x7a] sm:$0xff]  ;;  %v4239_v10 = vld [vmem:[%s4056_s21 + $0x6a] sm:$0xff]  ;;  %v4248_v13 = vld [vmem:[%s4056_s21 + $0xe2] sm:$0xff] }
  0x28   : > { %3485 = vmatprep.subr.msk.mxu0 %vm271_vm0, %v257_v23  ;;  %3519 = vmatprep.subr.msk.mxu1 %vm271_vm0, %v223_v24  ;;  %v4244_v11 = vld [vmem:[%s5014_s1 + $0x20] sm:$0xff]  ;;  %v229_v16 = vld [vmem:[%s4056_s21 + $0x118] sm:$0xff]  ;;  %v228_v19 = vld [vmem:[%s4056_s21 + $0x110] sm:$0xff] }
  0x29   : > { %v210_v12 = vld [vmem:[%s4056_s21 + $0x80] sm:$0xff]  ;;  %v4277_v21 = vld [vmem:[%s4056_s21 + $0xd2] sm:$0xff]  ;;  %v231_v22 = vld [vmem:[%s5014_s1 + $0x8] sm:$0xf] }
  0x2a   : > { %v194_v14 = vld [vmem:[%s4056_s21] sm:$0xff]  ;;  %v4291_v23 = vld [vmem:[%s4056_s21 + $0x52] sm:$0xff]  ;;  %v227_v24 = vld [vmem:[%s4056_s21 + $0x108] sm:$0xff] }
  0x2b   : > { %3486 = vmatpush3.xpose.msk.msra.mxu0 %vm271_vm0, %v241_v25  ;;  %3520 = vmatpush3.xpose.msk.msra.mxu1 %vm271_vm0, %v207_v26  ;;  %v4264_v17 = vld [vmem:[%s4056_s21 + $0xda] sm:$0xff]  ;;  %v4295_v25 = vld [vmem:[%s4056_s21 + $0xca] sm:$0xff] }
  0x2c   : > { %3487 = vmatprep.subr.msk.mxu0 %vm271_vm0, %v256_v27  ;;  %3521 = vmatprep.subr.msk.mxu1 %vm271_vm0, %v222_v28  ;;  %v4273_v18 = vld [vmem:[%s4056_s21 + $0x5a] sm:$0xff]  ;;  %v4306_v26 = vld [vmem:[%s4056_s21 + $0x4a] sm:$0xff]  ;;  %v4310_v28 = vld [vmem:[%s4056_s21 + $0xc2] sm:$0xff] }
  0x2d   : > { %v226_v27 = vld [vmem:[%s4056_s21 + $0x100] sm:$0xff] }
  0x2f   : > { %3488 = vmatpush3.xpose.msk.msra.mxu0 %vm271_vm0, %v240_v29  ;;  %3522 = vmatpush3.xpose.msk.msra.mxu1 %vm271_vm0, %v206_v30  ;;  %v4321_v29 = vld [vmem:[%s4056_s21 + $0x42] sm:$0xff]  ;;  %v4324_v30 = vld [vmem:[%s4056_s21 + $0xba] sm:$0xff] }
  0x30   : > { %3489 = vmatprep.subr.msk.mxu0 %vm271_vm0, %v255_v31  ;;  %3523 = vmatprep.subr.msk.mxu1 %vm271_vm0, %v221_v32  ;;  %v4327_v31 = vld [vmem:[%s4056_s21 + $0x11a] sm:$0xff]  ;;  %v4340_v32 = vld [vmem:[%s4056_s21 + $0xb2] sm:$0xff] }
  0x33   : > { %3490 = vmatpush3.xpose.msk.msra.mxu0 %vm271_vm0, %v239_v33  ;;  %3524 = vmatpush3.xpose.msk.msra.mxu1 %vm271_vm0, %v205_v34  ;;  %v4343_v33 = vld [vmem:[%s4056_s21 + $0x112] sm:$0xff] }
  0x34   : > { %3491 = vmatprep.subr.msk.mxu0 %vm271_vm0, %v254_v35  ;;  %3525 = vmatprep.subr.msk.mxu1 %vm271_vm0, %v220_v36  ;;  %v4355_v34 = vld [vmem:[%s4056_s21 + $0x32] sm:$0xff]  ;;  %v4358_v35 = vld [vmem:[%s4056_s21 + $0xaa] sm:$0xff] }
  0x35   : > { %v837_v36 = vld [vmem:[%s4056_s21 + $0x10a] sm:$0xff] }
  0x37   : > { %3492 = vmatpush3.xpose.msk.msra.mxu0 %vm271_vm0, %v238_v37  ;;  %3526 = vmatpush3.xpose.msk.msra.mxu1 %vm271_vm0, %v204_v38  ;;  %v4371_v37 = vld [vmem:[%s4056_s21 + $0x2a] sm:$0xff]  ;;  %v4374_v38 = vld [vmem:[%s4056_s21 + $0xa2] sm:$0xff] }
  0x38   : > { %3493 = vmatprep.subr.msk.mxu0 %vm271_vm0, %v253_v39  ;;  %3527 = vmatprep.subr.msk.mxu1 %vm271_vm0, %v219_v40  ;;  %v836_v39 = vld [vmem:[%s4056_s21 + $0x102] sm:$0xff] }
  0x39   : > { %v4384_v40 = vld [vmem:[%s4056_s21 + $0x22] sm:$0xff] }
  0x3b   : > { %3494 = vmatpush3.xpose.msk.msra.mxu0 %vm271_vm0, %v237_v41  ;;  %3528 = vmatpush3.xpose.msk.msra.mxu1 %vm271_vm0, %v203_v42  ;;  %v4387_v41 = vld [vmem:[%s4056_s21 + $0x9a] sm:$0xff]  ;;  %v3178_v42 = vld [vmem:[%s5014_s1 + $0x28] sm:$0xf] }
  0x3c   : > { %3495 = vmatprep.subr.msk.mxu0 %vm271_vm0, %v252_v43  ;;  %3529 = vmatprep.subr.msk.mxu1 %vm271_vm0, %v218_v44  ;;  %v4399_v43 = vld [vmem:[%s4056_s21 + $0x1a] sm:$0xff]  ;;  %v1130_v44 = vld [vmem:[%s4056_s21 + $0x8a] sm:$0xff] }
  0x3f   : > { %3496 = vmatpush3.xpose.msk.msra.mxu0 %vm271_vm0, %v236_v45  ;;  %3530 = vmatpush3.xpose.msk.msra.mxu1 %vm271_vm0, %v202_v46  ;;  %v4403_v45 = vld [vmem:[%s4056_s21 + $0x92] sm:$0xff] }
  0x40   : > { %3497 = vmatprep.subr.msk.mxu0 %vm271_vm0, %v251_v47  ;;  %3531 = vmatprep.subr.msk.mxu1 %vm271_vm0, %v217_v48  ;;  %v4409_v46 = vld [vmem:[%s5014_s1 + $0x30] sm:$0xff]  ;;  %v1129_v48 = vld [vmem:[%s4056_s21 + $0x82] sm:$0xff] }
  0x41   : > { %v4418_v47 = vld [vmem:[%s4056_s21 + $0x12] sm:$0xff] }
  0x43   : > { %3498 = vmatpush3.xpose.msk.msra.mxu0 %vm271_vm0, %v235_v49  ;;  %3532 = vmatpush3.xpose.msk.msra.mxu1 %vm271_vm0, %v201_v50  ;;  %v805_v49 = vld [vmem:[%s4056_s21 + $0xa] sm:$0xff]  ;;  %v804_v50 = vld [vmem:[%s4056_s21 + $0x2] sm:$0xff] }
  0x44   : > { %3499 = vmatprep.subr.msk.mxu0 %vm271_vm0, %v250_v51  ;;  %3533 = vmatprep.subr.msk.mxu1 %vm271_vm0, %v216_v52  ;;  %v1457_v51 = vld [vmem:[%s4056_s21 + $0x10b] sm:$0xff] }
  0x45   : > { %v1441_v52 = vld [vmem:[%s4056_s21 + $0x8b] sm:$0xff] }
  0x47   : > { %3500 = vmatpush3.xpose.msk.msra.mxu0 %vm271_vm0, %v234_v53  ;;  %3534 = vmatpush3.xpose.msk.msra.mxu1 %vm271_vm0, %v200_v54  ;;  %v1456_v53 = vld [vmem:[%s4056_s21 + $0x103] sm:$0xff] }
  0x48   : > { %3501 = vmatprep.subr.msk.mxu0 %vm271_vm0, %v249_v55  ;;  %3535 = vmatprep.subr.msk.mxu1 %vm271_vm0, %v215_v56  ;;  %v1440_v54 = vld [vmem:[%s4056_s21 + $0x83] sm:$0xff]  ;;  %v1455_v55 = vld [vmem:[%s4056_s21 + $0xfb] sm:$0xff] }
  0x49   : > { %v4461_v56 = vld [vmem:[%s5014_s1 + $0x40] sm:$0xff] }
  0x4b   : > { %3502 = vmatpush3.xpose.msk.msra.mxu0 %vm271_vm0, %v233_v57  ;;  %3536 = vmatpush3.xpose.msk.msra.mxu1 %vm271_vm0, %v199_v58  ;;  %v1439_v57 = vld [vmem:[%s4056_s21 + $0x7b] sm:$0xff]  ;;  %v1454_v58 = vld [vmem:[%s4056_s21 + $0xf3] sm:$0xff] }
  0x4c   : > { %3503 = vmatprep.subr.msk.mxu0 %vm271_vm0, %v248_v59  ;;  %3537 = vmatprep.subr.msk.mxu1 %vm271_vm0, %v214_v60  ;;  %v1438_v59 = vld [vmem:[%s4056_s21 + $0x73] sm:$0xff]  ;;  %v1453_v60 = vld [vmem:[%s4056_s21 + $0xeb] sm:$0xff] }
  0x4f   : > { %3504 = vmatpush3.xpose.msk.msra.mxu0 %vm271_vm0, %v232_v61  ;;  %3538 = vmatpush3.xpose.msk.msra.mxu1 %vm271_vm0, %v198_v62  ;;  %v1437_v61 = vld [vmem:[%s4056_s21 + $0x6b] sm:$0xff]  ;;  %v1452_v62 = vld [vmem:[%s4056_s21 + $0xe3] sm:$0xff] }
  0x50   : > { %3539 = vmatprep.subr.msk.mxu1 %vm271_vm0, %v213_v63  ;;  %3557 = vmatprep.subr.msk.mxu0 %vm271_vm0, %v4196_v1  ;;  %v1436_v63 = vld [vmem:[%s4056_s21 + $0x63] sm:$0xff] }
  0x52   : > { %3506 = vmatmul.mubr.msk.f32.vlgmr.msra.gmra.mxu0 %vm271_vm0, %v4044_v0  ;;  %v195_v0 = vld [vmem:[%s4056_s21 + $0x8] sm:$0xff] }
  0x53   : > { %3540 = vmatpush3.xpose.msk.msra.mxu1 %vm271_vm0, %v197_v2  ;;  %3558 = vmatpush3.xpose.msk.msra.mxu0 %vm271_vm0, %v4205_v3  ;;  %v1435_v2 = vld [vmem:[%s4056_s21 + $0x5b] sm:$0xff] }
  0x54   : > { %3541 = vmatprep.subr.msk.mxu1 %vm271_vm0, %v212_v4  ;;  %3559 = vmatprep.subr.msk.mxu0 %vm271_vm0, %v4209_v5  ;;  %v1434_v4 = vld [vmem:[%s4056_s21 + $0x53] sm:$0xff] }
  0x55   : > { %3507 = vmatprep.mubr.msk.f32.mxu0 %vm271_vm0, %v4091_v15 }
  0x56   : > { %3508 = vmatmul.mubr.msk.f32.gmra.mxu0 %vm271_vm0, %v4091_v15  ;;  %v4260_v15 = vld [vmem:[%s4056_s21 + $0x62] sm:$0xff] }
  0x57   : > { %3542 = vmatpush3.xpose.msk.msra.mxu1 %vm271_vm0, %v196_v6  ;;  %3560 = vmatpush3.xpose.msk.msra.mxu0 %vm271_vm0, %v4221_v7  ;;  %v1433_v6 = vld [vmem:[%s4056_s21 + $0x4b] sm:$0xff] }
  0x58   : > { %3543 = vmatprep.subr.msk.mxu1 %vm271_vm0, %v211_v8  ;;  %3561 = vmatprep.subr.msk.mxu0 %vm271_vm0, %v4225_v9  ;;  %v1432_v8 = vld [vmem:[%s4056_s21 + $0x43] sm:$0xff] }
  0x59   : > { %3589 = vmatprep.mubr.msk.f32.mxu0 %vm271_vm0, %v4244_v11 }
  0x5b   : > { %3544 = vmatpush3.xpose.msk.msra.mxu1 %vm271_vm0, %v195_v0  ;;  %3562 = vmatpush3.xpose.msk.msra.mxu0 %vm271_vm0, %v4239_v10  ;;  %v1431_v0 = vld [vmem:[%s4056_s21 + $0x3b] sm:$0xff] }
  0x5c   : > { %3545 = vmatprep.subr.msk.mxu1 %vm271_vm0, %v210_v12  ;;  %3563 = vmatprep.subr.msk.mxu0 %vm271_vm0, %v4248_v13  ;;  %v1150_v12 = vld [vmem:[%s4056_s21 + $0x12a] sm:$0xff] }
  0x5f   : > { %3546 = vmatpush3.xpose.msk.msra.mxu1 %vm271_vm0, %v194_v14  ;;  %3564 = vmatpush3.xpose.msk.msra.mxu0 %vm271_vm0, %v4260_v15  ;;  %v1429_v14 = vld [vmem:[%s4056_s21 + $0x2b] sm:$0xff] }
  0x60   : > { %3862 = vmatprep.subr.msk.mxu1 %vm271_vm0, %v229_v16  ;;  %3565 = vmatprep.subr.msk.mxu0 %vm271_vm0, %v4264_v17 }
  0x62   : > { %3548 = vmatmul.mubr.msk.f32.vlgmr.msra.gmra.mxu1 %vm271_vm0, %v4104_v20 }
  0x63   : > { %3863 = vmatpush3.xpose.msk.msra.mxu1 %vm271_vm0, %v229_v16  ;;  %3566 = vmatpush3.xpose.msk.msra.mxu0 %vm271_vm0, %v4273_v18  ;;  %v1149_v16 = vld [vmem:[%s4056_s21 + $0x122] sm:$0xff] }
  0x64   : > { %3864 = vmatprep.subr.msk.mxu1 %vm271_vm0, %v228_v19  ;;  %3567 = vmatprep.subr.msk.mxu0 %vm271_vm0, %v4277_v21 }
  0x65   : > { %3549 = vmatprep.mubr.msk.f32.mxu1 %vm271_vm0, %v231_v22 }
  0x66   : > { %3550 = vmatmul.mubr.msk.f32.gmra.mxu1 %vm271_vm0, %v231_v22 }
  0x67   : > { %3865 = vmatpush3.xpose.msk.msra.mxu1 %vm271_vm0, %v228_v19  ;;  %3568 = vmatpush3.xpose.msk.msra.mxu0 %vm271_vm0, %v4291_v23  ;;  %v1443_v19 = vld [vmem:[%s4056_s21 + $0x9b] sm:$0xff] }
  0x68   : > { %3866 = vmatprep.subr.msk.mxu1 %vm271_vm0, %v227_v24  ;;  %3569 = vmatprep.subr.msk.mxu0 %vm271_vm0, %v4295_v25 }
  0x69   : > { %3870 = vmatprep.mubr.msk.f32.mxu1 %vm271_vm0, %v4104_v20  ;;  %v4337_v20 = vld [vmem:[%s4056_s21 + $0x3a] sm:$0xff] }
  0x6b   : > { %3867 = vmatpush3.xpose.msk.msra.mxu1 %vm271_vm0, %v227_v24  ;;  %3570 = vmatpush3.xpose.msk.msra.mxu0 %vm271_vm0, %v4306_v26  ;;  %v1461_v24 = vld [vmem:[%s4056_s21 + $0x12b] sm:$0xff] }
  0x6c   : > { %3868 = vmatprep.subr.msk.mxu1 %vm271_vm0, %v226_v27  ;;  %3571 = vmatprep.subr.msk.mxu0 %vm271_vm0, %v4310_v28 }
  0x6f   : > { %3869 = vmatpush3.xpose.msk.msra.mxu1 %vm271_vm0, %v226_v27  ;;  %3572 = vmatpush3.xpose.msk.msra.mxu0 %vm271_vm0, %v4321_v29  ;;  %v1460_v27 = vld [vmem:[%s4056_s21 + $0x123] sm:$0xff] }
  0x70   : > { %3573 = vmatprep.subr.msk.mxu0 %vm271_vm0, %v4324_v30  ;;  %3873 = vmatprep.subr.msk.mxu1 %vm271_vm0, %v4327_v31 }
  0x72   : > { %3871 = vmatmul.mubr.msk.f32.vlgmr.msra.gmra.mxu1 %vm271_vm0, %v231_v22  ;;  %v1442_v22 = vld [vmem:[%s4056_s21 + $0x93] sm:$0xff] }
  0x73   : > { %3574 = vmatpush3.xpose.msk.msra.mxu0 %vm271_vm0, %v4337_v20  ;;  %3874 = vmatpush3.xpose.msk.msra.mxu1 %vm271_vm0, %v4327_v31 }
  0x74   : > { %3575 = vmatprep.subr.msk.mxu0 %vm271_vm0, %v4340_v32  ;;  %3875 = vmatprep.subr.msk.mxu1 %vm271_vm0, %v4343_v33 }
  0x75   : > { %3881 = vmatprep.mubr.msk.f32.mxu1 %vm271_vm0, %v4244_v11 }
  0x77   : > { %3576 = vmatpush3.xpose.msk.msra.mxu0 %vm271_vm0, %v4355_v34  ;;  %3876 = vmatpush3.xpose.msk.msra.mxu1 %vm271_vm0, %v4343_v33 }
  0x78   : > { %3577 = vmatprep.subr.msk.mxu0 %vm271_vm0, %v4358_v35  ;;  %3877 = vmatprep.subr.msk.mxu1 %vm271_vm0, %v837_v36 }
  0x7b   : > { %3578 = vmatpush3.xpose.msk.msra.mxu0 %vm271_vm0, %v4371_v37  ;;  %3878 = vmatpush3.xpose.msk.msra.mxu1 %vm271_vm0, %v837_v36 }
  0x7c   : > { %3579 = vmatprep.subr.msk.mxu0 %vm271_vm0, %v4374_v38  ;;  %3879 = vmatprep.subr.msk.mxu1 %vm271_vm0, %v836_v39 }
  0x7f   : > { %3580 = vmatpush3.xpose.msk.msra.mxu0 %vm271_vm0, %v4384_v40  ;;  %3880 = vmatpush3.xpose.msk.msra.mxu1 %vm271_vm0, %v836_v39 }
  0x80   : > { %3581 = vmatprep.subr.msk.mxu0 %vm271_vm0, %v4387_v41  ;;  %3599 = vmatprep.subr.msk.mxu1 %vm271_vm0, %v837_v36  ;;  %v4645_v36 = vld [vmem:[%s4056_s21 + $0x9c] sm:$0xff] }
  0x82   : > { %3882 = vmatmul.mubr.msk.f32.vlgmr.msra.gmra.mxu1 %vm271_vm0, %v3178_v42 }
  0x83   : > { %3582 = vmatpush3.xpose.msk.msra.mxu0 %vm271_vm0, %v4399_v43  ;;  %3600 = vmatpush3.xpose.msk.msra.mxu1 %vm271_vm0, %v1130_v44 }
  0x84   : > { %3583 = vmatprep.subr.msk.mxu0 %vm271_vm0, %v4403_v45  ;;  %3601 = vmatprep.subr.msk.mxu1 %vm271_vm0, %v836_v39  ;;  %v1751_v39 = vld [vmem:[%s4056_s21 + $0x84] sm:$0xff] }
  0x85   : > { %3631 = vmatprep.mubr.msk.f32.mxu1 %vm271_vm0, %v4409_v46 }
  0x87   : > { %3584 = vmatpush3.xpose.msk.msra.mxu0 %vm271_vm0, %v4418_v47  ;;  %3602 = vmatpush3.xpose.msk.msra.mxu1 %vm271_vm0, %v1129_v48 }
  0x88   : > { %3585 = vmatprep.subr.msk.mxu0 %vm271_vm0, %v1130_v44  ;;  %3603 = vmatprep.subr.msk.mxu1 %vm271_vm0, %v4196_v1  ;;  %v1451_v1 = vld [vmem:[%s4056_s21 + $0xdb] sm:$0xff] }
  0x89   : > { %v1749_v44 = vld [vmem:[%s4056_s21 + $0x74] sm:$0xff] }
  0x8b   : > { %3586 = vmatpush3.xpose.msk.msra.mxu0 %vm271_vm0, %v805_v49  ;;  %3604 = vmatpush3.xpose.msk.msra.mxu1 %vm271_vm0, %v4205_v3  ;;  %v1450_v3 = vld [vmem:[%s4056_s21 + $0xd3] sm:$0xff]  ;;  %v1762_v49 = vld [vmem:[%s4056_s21 + $0xdc] sm:$0xff] }
  0x8c   : > { %3587 = vmatprep.subr.msk.mxu0 %vm271_vm0, %v1129_v48  ;;  %3605 = vmatprep.subr.msk.mxu1 %vm271_vm0, %v4209_v5  ;;  %v1449_v5 = vld [vmem:[%s4056_s21 + $0xcb] sm:$0xff] }
  0x8d   : > { %v1747_v48 = vld [vmem:[%s4056_s21 + $0x64] sm:$0xff] }
  0x8f   : > { %3588 = vmatpush3.xpose.msk.msra.mxu0 %vm271_vm0, %v804_v50  ;;  %3606 = vmatpush3.xpose.msk.msra.mxu1 %vm271_vm0, %v4221_v7  ;;  %v1448_v7 = vld [vmem:[%s4056_s21 + $0xc3] sm:$0xff] }
  0x90   : > { %3607 = vmatprep.subr.msk.mxu1 %vm271_vm0, %v4225_v9  ;;  %3641 = vmatprep.subr.msk.mxu0 %vm271_vm0, %v1457_v51  ;;  %v1447_v9 = vld [vmem:[%s4056_s21 + $0xbb] sm:$0xff] }
  0x91   : > { %v1746_v50 = vld [vmem:[%s4056_s21 + $0x5c] sm:$0xff]  ;;  %v1761_v51 = vld [vmem:[%s4056_s21 + $0xd4] sm:$0xff] }
  0x92   : > { %3590 = vmatmul.mubr.msk.f32.vlgmr.msra.gmra.mxu0 %vm271_vm0, %v4244_v11  ;;  %v1430_v11 = vld [vmem:[%s4056_s21 + $0x33] sm:$0xff] }
  0x93   : > { %3608 = vmatpush3.xpose.msk.msra.mxu1 %vm271_vm0, %v4239_v10  ;;  %3642 = vmatpush3.xpose.msk.msra.mxu0 %vm271_vm0, %v1441_v52  ;;  %v1446_v10 = vld [vmem:[%s4056_s21 + $0xb3] sm:$0xff] }
  0x94   : > { %3591 = vmatprep.mubr.msk.f32.mxu0 %vm271_vm0, %v3178_v42  ;;  %3609 = vmatprep.subr.msk.mxu1 %vm271_vm0, %v4248_v13  ;;  %v1445_v13 = vld [vmem:[%s4056_s21 + $0xab] sm:$0xff]  ;;  %v1745_v52 = vld [vmem:[%s4056_s21 + $0x54] sm:$0xff] }
  0x95   : > { %3643 = vmatprep.subr.msk.mxu0 %vm271_vm0, %v1456_v53  ;;  %v1760_v53 = vld [vmem:[%s4056_s21 + $0xcc] sm:$0xff] }
  0x96   : > { %3592 = vmatmul.mubr.msk.f32.gmra.mxu0 %vm271_vm0, %v3178_v42  ;;  %v1750_v42 = vld [vmem:[%s4056_s21 + $0x7c] sm:$0xff] }
  0x97   : > { %3610 = vmatpush3.xpose.msk.msra.mxu1 %vm271_vm0, %v4260_v15  ;;  %3644 = vmatpush3.xpose.msk.msra.mxu0 %vm271_vm0, %v1440_v54  ;;  %v3220_v15 = vld [vmem:[%s5014_s1 + $0x38] sm:$0xf]  ;;  %v1744_v54 = vld [vmem:[%s4056_s21 + $0x4c] sm:$0xff] }
  0x98   : > { %3611 = vmatprep.subr.msk.mxu1 %vm271_vm0, %v4264_v17  ;;  %3645 = vmatprep.subr.msk.mxu0 %vm271_vm0, %v1455_v55  ;;  %v1444_v17 = vld [vmem:[%s4056_s21 + $0xa3] sm:$0xff] }
  0x99   : > { %3673 = vmatprep.mubr.msk.f32.mxu0 %vm271_vm0, %v4461_v56  ;;  %v1759_v55 = vld [vmem:[%s4056_s21 + $0xc4] sm:$0xff] }
  0x9b   : > { %3612 = vmatpush3.xpose.msk.msra.mxu1 %vm271_vm0, %v4273_v18  ;;  %3646 = vmatpush3.xpose.msk.msra.mxu0 %vm271_vm0, %v1439_v57  ;;  %v1428_v18 = vld [vmem:[%s4056_s21 + $0x23] sm:$0xff] }
  0x9c   : > { %3613 = vmatprep.subr.msk.mxu1 %vm271_vm0, %v4277_v21  ;;  %3647 = vmatprep.subr.msk.mxu0 %vm271_vm0, %v1454_v58  ;;  %v1427_v21 = vld [vmem:[%s4056_s21 + $0x1b] sm:$0xff] }
  0x9d   : > { %v1758_v57 = vld [vmem:[%s4056_s21 + $0xbc] sm:$0xff] }
  0x9e   : > { %v1742_v58 = vld [vmem:[%s4056_s21 + $0x3c] sm:$0xff] }
  0x9f   : > { %3614 = vmatpush3.xpose.msk.msra.mxu1 %vm271_vm0, %v4291_v23  ;;  %3648 = vmatpush3.xpose.msk.msra.mxu0 %vm271_vm0, %v1438_v59  ;;  %v1426_v23 = vld [vmem:[%s4056_s21 + $0x13] sm:$0xff] }
  0xa0   : > { %3615 = vmatprep.subr.msk.mxu1 %vm271_vm0, %v4295_v25  ;;  %3649 = vmatprep.subr.msk.mxu0 %vm271_vm0, %v1453_v60  ;;  %v4585_v25 = vld [vmem:[%s4056_s21 + $0x12c] sm:$0xff]  ;;  %v1757_v59 = vld [vmem:[%s4056_s21 + $0xb4] sm:$0xff] }
  0xa1   : > { %v1741_v60 = vld [vmem:[%s4056_s21 + $0x34] sm:$0xff] }
  0xa3   : > { %3616 = vmatpush3.xpose.msk.msra.mxu1 %vm271_vm0, %v4306_v26  ;;  %3650 = vmatpush3.xpose.msk.msra.mxu0 %vm271_vm0, %v1437_v61  ;;  %v3262_v26 = vld [vmem:[%s5014_s1 + $0x48] sm:$0xf]  ;;  %v1756_v61 = vld [vmem:[%s4056_s21 + $0xac] sm:$0xff] }
  0xa4   : > { %3617 = vmatprep.subr.msk.mxu1 %vm271_vm0, %v4310_v28  ;;  %3651 = vmatprep.subr.msk.mxu0 %vm271_vm0, %v1452_v62  ;;  %v4601_v28 = vld [vmem:[%s4056_s21 + $0x124] sm:$0xff]  ;;  %v1740_v62 = vld [vmem:[%s4056_s21 + $0x2c] sm:$0xff] }
  0xa7   : > { %3618 = vmatpush3.xpose.msk.msra.mxu1 %vm271_vm0, %v4321_v29  ;;  %3652 = vmatpush3.xpose.msk.msra.mxu0 %vm271_vm0, %v1436_v63  ;;  %v4611_v29 = vld [vmem:[%s5014_s1 + $0x50] sm:$0xff]  ;;  %v1755_v63 = vld [vmem:[%s4056_s21 + $0xa4] sm:$0xff] }
  0xa8   : > { %3619 = vmatprep.subr.msk.mxu1 %vm271_vm0, %v4324_v30  ;;  %3653 = vmatprep.subr.msk.mxu0 %vm271_vm0, %v1451_v1  ;;  %v1459_v30 = vld [vmem:[%s4056_s21 + $0x11b] sm:$0xff]  ;;  %v1739_v1 = vld [vmem:[%s4056_s21 + $0x24] sm:$0xff] }
  0xab   : > { %3620 = vmatpush3.xpose.msk.msra.mxu1 %vm271_vm0, %v4337_v20  ;;  %3654 = vmatpush3.xpose.msk.msra.mxu0 %vm271_vm0, %v1435_v2  ;;  %v1458_v20 = vld [vmem:[%s4056_s21 + $0x113] sm:$0xff]  ;;  %v1738_v2 = vld [vmem:[%s4056_s21 + $0x1c] sm:$0xff] }
  0xac   : > { %3621 = vmatprep.subr.msk.mxu1 %vm271_vm0, %v4340_v32  ;;  %3655 = vmatprep.subr.msk.mxu0 %vm271_vm0, %v1450_v3  ;;  %v1769_v32 = vld [vmem:[%s4056_s21 + $0x114] sm:$0xff] }
  0xad   : > { %v1737_v3 = vld [vmem:[%s4056_s21 + $0x14] sm:$0xff] }
  0xaf   : > { %3622 = vmatpush3.xpose.msk.msra.mxu1 %vm271_vm0, %v4355_v34  ;;  %3656 = vmatpush3.xpose.msk.msra.mxu0 %vm271_vm0, %v1434_v4  ;;  %v1752_v34 = vld [vmem:[%s4056_s21 + $0x8c] sm:$0xff]  ;;  %v2083_v4 = vld [vmem:[%s4056_s21 + $0x13c] sm:$0xff] }
  0xb0   : > { %3623 = vmatprep.subr.msk.mxu1 %vm271_vm0, %v4358_v35  ;;  %3657 = vmatprep.subr.msk.mxu0 %vm271_vm0, %v1449_v5  ;;  %v4641_v35 = vld [vmem:[%s5014_s1 + $0x58] sm:$0xf]  ;;  %v2394_v5 = vld [vmem:[%s4056_s21 + $0x13d] sm:$0xff] }
  0xb3   : > { %3624 = vmatpush3.xpose.msk.msra.mxu1 %vm271_vm0, %v4371_v37  ;;  %3658 = vmatpush3.xpose.msk.msra.mxu0 %vm271_vm0, %v1433_v6  ;;  %v1767_v37 = vld [vmem:[%s4056_s21 + $0x104] sm:$0xff]  ;;  %v2082_v6 = vld [vmem:[%s4056_s21 + $0x134] sm:$0xff] }
  0xb4   : > { %3625 = vmatprep.subr.msk.mxu1 %vm271_vm0, %v4374_v38  ;;  %3659 = vmatprep.subr.msk.mxu0 %vm271_vm0, %v1448_v7  ;;  %v4655_v38 = vld [vmem:[%s5014_s1 + $0x60] sm:$0xff]  ;;  %v3346_v7 = vld [vmem:[%s5014_s1 + $0x68] sm:$0xf] }
  0xb7   : > { %3626 = vmatpush3.xpose.msk.msra.mxu1 %vm271_vm0, %v4384_v40  ;;  %3660 = vmatpush3.xpose.msk.msra.mxu0 %vm271_vm0, %v1432_v8  ;;  %v4663_v40 = vld [vmem:[%s4056_s21 + $0x94] sm:$0xff] }
  0xb8   : > { %3627 = vmatprep.subr.msk.mxu1 %vm271_vm0, %v4387_v41  ;;  %3661 = vmatprep.subr.msk.mxu0 %vm271_vm0, %v1447_v9  ;;  %v1766_v41 = vld [vmem:[%s4056_s21 + $0xfc] sm:$0xff]  ;;  %v2392_v9 = vld [vmem:[%s4056_s21 + $0x12d] sm:$0xff] }
  0xb9   : > { %v2393_v8 = vld [vmem:[%s4056_s21 + $0x135] sm:$0xff] }
  0xbb   : > { %3628 = vmatpush3.xpose.msk.msra.mxu1 %vm271_vm0, %v4399_v43  ;;  %3662 = vmatpush3.xpose.msk.msra.mxu0 %vm271_vm0, %v1431_v0  ;;  %v1765_v43 = vld [vmem:[%s4056_s21 + $0xf4] sm:$0xff] }
  0xbc   : > { %3629 = vmatprep.subr.msk.mxu1 %vm271_vm0, %v4403_v45  ;;  %3663 = vmatprep.subr.msk.mxu0 %vm271_vm0, %v1446_v10  ;;  %v1764_v45 = vld [vmem:[%s4056_s21 + $0xec] sm:$0xff]  ;;  %v2981_v10 = vld [vmem:[%s5015_s2] sm:$0xff] }
  0xbd   : > { %v4784_v0 = vld [vmem:[%s5014_s1 + $0x70] sm:$0xff] }
  0xbf   : > { %3630 = vmatpush3.xpose.msk.msra.mxu1 %vm271_vm0, %v4418_v47  ;;  %3664 = vmatpush3.xpose.msk.msra.mxu0 %vm271_vm0, %v1430_v11  ;;  %v1763_v47 = vld [vmem:[%s4056_s21 + $0xe4] sm:$0xff] }
  0xc0   : > { %3884 = vmatprep.subr.msk.mxu1 %vm271_vm0, %v1150_v12  ;;  %3665 = vmatprep.subr.msk.mxu0 %vm271_vm0, %v1445_v13  ;;  %v2391_v11 = vld [vmem:[%s4056_s21 + $0x125] sm:$0xff] }
  0xc1   : > { %v2982_v13 = vld [vmem:[%s5015_s2 + $0x8] sm:$0xf] }
  0xc2   : > { %3632 = vmatmul.mubr.msk.f32.vlgmr.msra.gmra.mxu1 %vm271_vm0, %v4409_v46 }
  0xc3   : > { %3885 = vmatpush3.xpose.msk.msra.mxu1 %vm271_vm0, %v1150_v12  ;;  %3666 = vmatpush3.xpose.msk.msra.mxu0 %vm271_vm0, %v1429_v14  ;;  %v4002_v12 = vmov 0   ;;  %v2390_v14 = vld [vmem:[%s4056_s21 + $0x11d] sm:$0xff] }
  0xc4   : > { %3633 = vmatprep.mubr.msk.f32.mxu1 %vm271_vm0, %v3220_v15  ;;  %3886 = vmatprep.subr.msk.mxu1 %vm271_vm0, %v1149_v16 }
  0xc5   : > { %3667 = vmatprep.subr.msk.mxu0 %vm271_vm0, %v1444_v17  ;;  %3977 = vset.pattern.permute.xlu0 %v4002_v12  ;;  %v4817_v17 = vld [vmem:[%s5014_s1 + $0x78] sm:$0xf]  ;;  %v2671_v12 = vld [vmem:[%s4056_s21 + $0x2e] sm:$0xff] }
  0xc6   : > { %3634 = vmatmul.mubr.msk.f32.gmra.mxu1 %vm271_vm0, %v3220_v15  ;;  %2985 = vperm.xlu0 %3977, %v2981_v10   ;;  %v2687_v10 = vld [vmem:[%s4056_s21 + $0xae] sm:$0xff] }
  0xc7   : > { %3887 = vmatpush3.xpose.msk.msra.mxu1 %vm271_vm0, %v1149_v16  ;;  %3668 = vmatpush3.xpose.msk.msra.mxu0 %vm271_vm0, %v1428_v18  ;;  %v2374_v16 = vld [vmem:[%s4056_s21 + $0x9d] sm:$0xff] }
  0xc8   : > { %3888 = vmatprep.subr.msk.mxu1 %vm271_vm0, %v4327_v31  ;;  %3669 = vmatprep.subr.msk.mxu0 %vm271_vm0, %v1443_v19  ;;  %v2685_v18 = vld [vmem:[%s4056_s21 + $0x9e] sm:$0xff]  ;;  %v2389_v19 = vld [vmem:[%s4056_s21 + $0x115] sm:$0xff] }
  0xc9   : > { %3892 = vmatprep.mubr.msk.f32.mxu1 %vm271_vm0, %v4409_v46  ;;  %v1748_v46 = vld [vmem:[%s4056_s21 + $0x6c] sm:$0xff] }
  0xca   : > { %2990 = vperm.xlu0 %3977, %v2982_v13   ;;  %v2375_v13 = vld [vmem:[%s4056_s21 + $0xa5] sm:$0xff] }
  0xcb   : > { %3889 = vmatpush3.xpose.msk.msra.mxu1 %vm271_vm0, %v4327_v31  ;;  %3670 = vmatpush3.xpose.msk.msra.mxu0 %vm271_vm0, %v1427_v21  ;;  %v1770_v31 = vld [vmem:[%s4056_s21 + $0x11c] sm:$0xff] }
  0xcc   : > { %3890 = vmatprep.subr.msk.mxu1 %vm271_vm0, %v4343_v33  ;;  %3671 = vmatprep.subr.msk.mxu0 %vm271_vm0, %v1442_v22  ;;  %v2700_v21 = vld [vmem:[%s4056_s21 + $0x116] sm:$0xff]  ;;  %v4830_v22 = vld [vmem:[%s5014_s1 + $0x80] sm:$0xff] }
  0xcf   : > { %3891 = vmatpush3.xpose.msk.msra.mxu1 %vm271_vm0, %v4343_v33  ;;  %3672 = vmatpush3.xpose.msk.msra.mxu0 %vm271_vm0, %v1426_v23  ;;  %v1768_v33 = vld [vmem:[%s4056_s21 + $0x10c] sm:$0xff]  ;;  %v2373_v23 = vld [vmem:[%s4056_s21 + $0x95] sm:$0xff] }
  0xd0   : > { %3895 = vmatprep.subr.msk.mxu1 %vm271_vm0, %v1461_v24  ;;  %3906 = vmatprep.subr.msk.mxu0 %vm271_vm0, %v4585_v25 }
  0xd2   : > { %3893 = vmatmul.mubr.msk.f32.vlgmr.msra.gmra.mxu1 %vm271_vm0, %v3220_v15  ;;  %3674 = vmatmul.mubr.msk.f32.vlgmr.msra.gmra.mxu0 %vm271_vm0, %v4461_v56  ;;  %v2701_v15 = vld [vmem:[%s4056_s21 + $0x11e] sm:$0xff] }
  0xd3   : > { %3896 = vmatpush3.xpose.msk.msra.mxu1 %vm271_vm0, %v1461_v24  ;;  %3675 = vmatprep.mubr.msk.f32.mxu0 %vm271_vm0, %v3262_v26  ;;  %v2684_v24 = vld [vmem:[%s4056_s21 + $0x96] sm:$0xff] }
  0xd4   : > { %3907 = vmatpush3.xpose.msk.msra.mxu0 %vm271_vm0, %v4585_v25  ;;  %3897 = vmatprep.subr.msk.mxu1 %vm271_vm0, %v1460_v27 }
  0xd5   : > { %3908 = vmatprep.subr.msk.mxu0 %vm271_vm0, %v4601_v28  ;;  %3903 = vmatprep.mubr.msk.f32.mxu1 %vm271_vm0, %v4461_v56  ;;  %v1743_v56 = vld [vmem:[%s4056_s21 + $0x44] sm:$0xff] }
  0xd6   : > { %3676 = vmatmul.mubr.msk.f32.gmra.mxu0 %vm271_vm0, %v3262_v26 }
  0xd7   : > { %3898 = vmatpush3.xpose.msk.msra.mxu1 %vm271_vm0, %v1460_v27  ;;  %3914 = vmatprep.mubr.msk.f32.mxu0 %vm271_vm0, %v4611_v29  ;;  %v2372_v27 = vld [vmem:[%s4056_s21 + $0x8d] sm:$0xff] }
  0xd8   : > { %3909 = vmatpush3.xpose.msk.msra.mxu0 %vm271_vm0, %v4601_v28  ;;  %3899 = vmatprep.subr.msk.mxu1 %vm271_vm0, %v1459_v30 }
  0xd9   : > { %3910 = vmatprep.subr.msk.mxu0 %vm271_vm0, %v1770_v31 }
  0xdb   : > { %3900 = vmatpush3.xpose.msk.msra.mxu1 %vm271_vm0, %v1459_v30  ;;  %v2698_v30 = vld [vmem:[%s4056_s21 + $0x106] sm:$0xff] }
  0xdc   : > { %3911 = vmatpush3.xpose.msk.msra.mxu0 %vm271_vm0, %v1770_v31  ;;  %3901 = vmatprep.subr.msk.mxu1 %vm271_vm0, %v1458_v20 }
  0xdd   : > { %3912 = vmatprep.subr.msk.mxu0 %vm271_vm0, %v1769_v32 }
  0xdf   : > { %3902 = vmatpush3.xpose.msk.msra.mxu1 %vm271_vm0, %v1458_v20  ;;  %v2682_v20 = vld [vmem:[%s4056_s21 + $0x86] sm:$0xff] }
  0xe0   : > { %3913 = vmatpush3.xpose.msk.msra.mxu0 %vm271_vm0, %v1769_v32  ;;  %3683 = vmatprep.subr.msk.mxu1 %vm271_vm0, %v1768_v33 }
  0xe1   : > { %3725 = vmatprep.subr.msk.mxu0 %vm271_vm0, %v1770_v31  ;;  %v2371_v31 = vld [vmem:[%s4056_s21 + $0x85] sm:$0xff] }
  0xe2   : > { %3904 = vmatmul.mubr.msk.f32.vlgmr.msra.gmra.mxu1 %vm271_vm0, %v3262_v26  ;;  %v2699_v26 = vld [vmem:[%s4056_s21 + $0x10e] sm:$0xff] }
  0xe3   : > { %3684 = vmatpush3.xpose.msk.msra.mxu1 %vm271_vm0, %v1752_v34  ;;  %3915 = vmatmul.mubr.msk.f32.vlgmr.msra.gmra.mxu0 %vm271_vm0, %v4641_v35 }
  0xe4   : > { %3726 = vmatpush3.xpose.msk.msra.mxu0 %vm271_vm0, %v4645_v36  ;;  %3685 = vmatprep.subr.msk.mxu1 %vm271_vm0, %v1767_v37 }
  0xe5   : > { %3727 = vmatprep.subr.msk.mxu0 %vm271_vm0, %v1769_v32  ;;  %3715 = vmatprep.mubr.msk.f32.mxu1 %vm271_vm0, %v4611_v29  ;;  %v2386_v32 = vld [vmem:[%s4056_s21 + $0xfd] sm:$0xff] }
  0xe6   : > { %3757 = vmatprep.mubr.msk.f32.mxu0 %vm271_vm0, %v4655_v38 }
  0xe7   : > { %3686 = vmatpush3.xpose.msk.msra.mxu1 %vm271_vm0, %v1751_v39 }
  0xe8   : > { %3728 = vmatpush3.xpose.msk.msra.mxu0 %vm271_vm0, %v4663_v40  ;;  %3687 = vmatprep.subr.msk.mxu1 %vm271_vm0, %v1766_v41 }
  0xe9   : > { %3729 = vmatprep.subr.msk.mxu0 %vm271_vm0, %v1768_v33  ;;  %v2697_v33 = vld [vmem:[%s4056_s21 + $0xfe] sm:$0xff] }
  0xeb   : > { %3688 = vmatpush3.xpose.msk.msra.mxu1 %vm271_vm0, %v1750_v42 }
  0xec   : > { %3730 = vmatpush3.xpose.msk.msra.mxu0 %vm271_vm0, %v1752_v34  ;;  %3689 = vmatprep.subr.msk.mxu1 %vm271_vm0, %v1765_v43  ;;  %v2370_v34 = vld [vmem:[%s4056_s21 + $0x7d] sm:$0xff] }
  0xed   : > { %3731 = vmatprep.subr.msk.mxu0 %vm271_vm0, %v1767_v37  ;;  %v2696_v37 = vld [vmem:[%s4056_s21 + $0xf6] sm:$0xff] }
  0xef   : > { %3690 = vmatpush3.xpose.msk.msra.mxu1 %vm271_vm0, %v1749_v44 }
  0xf0   : > { %3732 = vmatpush3.xpose.msk.msra.mxu0 %vm271_vm0, %v1751_v39  ;;  %3691 = vmatprep.subr.msk.mxu1 %vm271_vm0, %v1764_v45  ;;  %v2680_v39 = vld [vmem:[%s4056_s21 + $0x76] sm:$0xff] }
  0xf1   : > { %3733 = vmatprep.subr.msk.mxu0 %vm271_vm0, %v1766_v41  ;;  %v2695_v41 = vld [vmem:[%s4056_s21 + $0xee] sm:$0xff] }
  0xf3   : > { %3692 = vmatpush3.xpose.msk.msra.mxu1 %vm271_vm0, %v1748_v46 }
  0xf4   : > { %3734 = vmatpush3.xpose.msk.msra.mxu0 %vm271_vm0, %v1750_v42  ;;  %3693 = vmatprep.subr.msk.mxu1 %vm271_vm0, %v1763_v47  ;;  %v2368_v42 = vld [vmem:[%s4056_s21 + $0x6d] sm:$0xff] }
  0xf5   : > { %3735 = vmatprep.subr.msk.mxu0 %vm271_vm0, %v1765_v43  ;;  %v2679_v43 = vld [vmem:[%s4056_s21 + $0x6e] sm:$0xff] }
  0xf7   : > { %3694 = vmatpush3.xpose.msk.msra.mxu1 %vm271_vm0, %v1747_v48 }
  0xf8   : > { %3736 = vmatpush3.xpose.msk.msra.mxu0 %vm271_vm0, %v1749_v44  ;;  %3695 = vmatprep.subr.msk.mxu1 %vm271_vm0, %v1762_v49  ;;  %v2383_v44 = vld [vmem:[%s4056_s21 + $0xe5] sm:$0xff] }
  0xf9   : > { %3737 = vmatprep.subr.msk.mxu0 %vm271_vm0, %v1764_v45  ;;  %v2694_v45 = vld [vmem:[%s4056_s21 + $0xe6] sm:$0xff] }
  0xfb   : > { %3696 = vmatpush3.xpose.msk.msra.mxu1 %vm271_vm0, %v1746_v50 }
  0xfc   : > { %3738 = vmatpush3.xpose.msk.msra.mxu0 %vm271_vm0, %v1748_v46  ;;  %3697 = vmatprep.subr.msk.mxu1 %vm271_vm0, %v1761_v51  ;;  %v2367_v46 = vld [vmem:[%s4056_s21 + $0x65] sm:$0xff] }
  0xfd   : > { %3739 = vmatprep.subr.msk.mxu0 %vm271_vm0, %v1763_v47  ;;  %v2678_v47 = vld [vmem:[%s4056_s21 + $0x66] sm:$0xff] }
  0xff   : > { %3698 = vmatpush3.xpose.msk.msra.mxu1 %vm271_vm0, %v1745_v52 }
 0x100   : > { %3740 = vmatpush3.xpose.msk.msra.mxu0 %vm271_vm0, %v1747_v48  ;;  %3699 = vmatprep.subr.msk.mxu1 %vm271_vm0, %v1760_v53  ;;  %v2382_v48 = vld [vmem:[%s4056_s21 + $0xdd] sm:$0xff] }
 0x101   : > { %3741 = vmatprep.subr.msk.mxu0 %vm271_vm0, %v1762_v49  ;;  %v2693_v49 = vld [vmem:[%s4056_s21 + $0xde] sm:$0xff] }
 0x103   : > { %3700 = vmatpush3.xpose.msk.msra.mxu1 %vm271_vm0, %v1744_v54 }
 0x104   : > { %3742 = vmatpush3.xpose.msk.msra.mxu0 %vm271_vm0, %v1746_v50  ;;  %3701 = vmatprep.subr.msk.mxu1 %vm271_vm0, %v1759_v55  ;;  %v2366_v50 = vld [vmem:[%s4056_s21 + $0x5d] sm:$0xff] }
 0x105   : > { %3743 = vmatprep.subr.msk.mxu0 %vm271_vm0, %v1761_v51  ;;  %v2677_v51 = vld [vmem:[%s4056_s21 + $0x5e] sm:$0xff] }
 0x107   : > { %3702 = vmatpush3.xpose.msk.msra.mxu1 %vm271_vm0, %v1743_v56 }
 0x108   : > { %3744 = vmatpush3.xpose.msk.msra.mxu0 %vm271_vm0, %v1745_v52  ;;  %3703 = vmatprep.subr.msk.mxu1 %vm271_vm0, %v1758_v57  ;;  %v2381_v52 = vld [vmem:[%s4056_s21 + $0xd5] sm:$0xff] }
 0x109   : > { %3745 = vmatprep.subr.msk.mxu0 %vm271_vm0, %v1760_v53  ;;  %v2692_v53 = vld [vmem:[%s4056_s21 + $0xd6] sm:$0xff] }
 0x10b   : > { %3704 = vmatpush3.xpose.msk.msra.mxu1 %vm271_vm0, %v1742_v58 }
 0x10c   : > { %3746 = vmatpush3.xpose.msk.msra.mxu0 %vm271_vm0, %v1744_v54  ;;  %3705 = vmatprep.subr.msk.mxu1 %vm271_vm0, %v1757_v59  ;;  %v2365_v54 = vld [vmem:[%s4056_s21 + $0x55] sm:$0xff] }
 0x10d   : > { %3747 = vmatprep.subr.msk.mxu0 %vm271_vm0, %v1759_v55  ;;  %v2676_v55 = vld [vmem:[%s4056_s21 + $0x56] sm:$0xff] }
 0x10f   : > { %3706 = vmatpush3.xpose.msk.msra.mxu1 %vm271_vm0, %v1741_v60 }
 0x110   : > { %3748 = vmatpush3.xpose.msk.msra.mxu0 %vm271_vm0, %v1743_v56  ;;  %3707 = vmatprep.subr.msk.mxu1 %vm271_vm0, %v1756_v61  ;;  %v2380_v56 = vld [vmem:[%s4056_s21 + $0xcd] sm:$0xff] }
 0x111   : > { %3749 = vmatprep.subr.msk.mxu0 %vm271_vm0, %v1758_v57  ;;  %v2691_v57 = vld [vmem:[%s4056_s21 + $0xce] sm:$0xff] }
 0x113   : > { %3708 = vmatpush3.xpose.msk.msra.mxu1 %vm271_vm0, %v1740_v62 }
 0x114   : > { %3750 = vmatpush3.xpose.msk.msra.mxu0 %vm271_vm0, %v1742_v58  ;;  %3709 = vmatprep.subr.msk.mxu1 %vm271_vm0, %v1755_v63  ;;  %v2364_v58 = vld [vmem:[%s4056_s21 + $0x4d] sm:$0xff] }
 0x115   : > { %3751 = vmatprep.subr.msk.mxu0 %vm271_vm0, %v1757_v59  ;;  %v2675_v59 = vld [vmem:[%s4056_s21 + $0x4e] sm:$0xff] }
 0x117   : > { %3710 = vmatpush3.xpose.msk.msra.mxu1 %vm271_vm0, %v1739_v1 }
 0x118   : > { %3752 = vmatpush3.xpose.msk.msra.mxu0 %vm271_vm0, %v1741_v60  ;;  %3711 = vmatprep.subr.msk.mxu1 %vm271_vm0, %v4645_v36  ;;  %v2385_v36 = vld [vmem:[%s4056_s21 + $0xf5] sm:$0xff]  ;;  %v2379_v60 = vld [vmem:[%s4056_s21 + $0xc5] sm:$0xff] }
 0x119   : > { %3753 = vmatprep.subr.msk.mxu0 %vm271_vm0, %v1756_v61  ;;  %v2690_v61 = vld [vmem:[%s4056_s21 + $0xc6] sm:$0xff] }
 0x11b   : > { %3712 = vmatpush3.xpose.msk.msra.mxu1 %vm271_vm0, %v1738_v2  ;;  %v2689_v2 = vld [vmem:[%s4056_s21 + $0xbe] sm:$0xff] }
 0x11c   : > { %3754 = vmatpush3.xpose.msk.msra.mxu0 %vm271_vm0, %v1740_v62  ;;  %3713 = vmatprep.subr.msk.mxu1 %vm271_vm0, %v4663_v40  ;;  %v2384_v40 = vld [vmem:[%s4056_s21 + $0xed] sm:$0xff]  ;;  %v2363_v62 = vld [vmem:[%s4056_s21 + $0x45] sm:$0xff] }
 0x11d   : > { %3755 = vmatprep.subr.msk.mxu0 %vm271_vm0, %v1755_v63  ;;  %v2674_v63 = vld [vmem:[%s4056_s21 + $0x46] sm:$0xff] }
 0x11f   : > { %3714 = vmatpush3.xpose.msk.msra.mxu1 %vm271_vm0, %v1737_v3  ;;  %v2362_v3 = vld [vmem:[%s4056_s21 + $0x3d] sm:$0xff] }
 0x120   : > { %3756 = vmatpush3.xpose.msk.msra.mxu0 %vm271_vm0, %v1739_v1  ;;  %3917 = vmatprep.subr.msk.mxu1 %vm271_vm0, %v2083_v4  ;;  %v2378_v1 = vld [vmem:[%s4056_s21 + $0xbd] sm:$0xff] }
 0x121   : > { %3928 = vmatprep.subr.msk.mxu0 %vm271_vm0, %v2394_v5 }
 0x122   : > { %3716 = vmatmul.mubr.msk.f32.vlgmr.msra.gmra.mxu1 %vm271_vm0, %v4611_v29  ;;  %v2387_v29 = vld [vmem:[%s4056_s21 + $0x105] sm:$0xff] }
 0x123   : > { %3918 = vmatpush3.xpose.msk.msra.mxu1 %vm271_vm0, %v2083_v4  ;;  %3758 = vmatmul.mubr.msk.f32.vlgmr.msra.gmra.mxu0 %vm271_vm0, %v4655_v38  ;;  %v2673_v4 = vld [vmem:[%s4056_s21 + $0x3e] sm:$0xff] }
 0x124   : > { %3717 = vmatprep.mubr.msk.f32.mxu1 %vm271_vm0, %v4641_v35  ;;  %3929 = vmatpush3.xpose.msk.msra.mxu0 %vm271_vm0, %v2394_v5  ;;  %v2377_v5 = vld [vmem:[%s4056_s21 + $0xb5] sm:$0xff] }
 0x125   : > { %3919 = vmatprep.subr.msk.mxu1 %vm271_vm0, %v2082_v6  ;;  %3759 = vmatprep.mubr.msk.f32.mxu0 %vm271_vm0, %v3346_v7 }
 0x126   : > { %3718 = vmatmul.mubr.msk.f32.gmra.mxu1 %vm271_vm0, %v4641_v35  ;;  %3930 = vmatprep.subr.msk.mxu0 %vm271_vm0, %v2393_v8  ;;  %v2681_v35 = vld [vmem:[%s4056_s21 + $0x7e] sm:$0xff] }
 0x127   : > { %3920 = vmatpush3.xpose.msk.msra.mxu1 %vm271_vm0, %v2082_v6  ;;  %3760 = vmatmul.mubr.msk.f32.gmra.mxu0 %vm271_vm0, %v3346_v7  ;;  %v2688_v6 = vld [vmem:[%s4056_s21 + $0xb6] sm:$0xff] }
 0x128   : > { %3931 = vmatpush3.xpose.msk.msra.mxu0 %vm271_vm0, %v2393_v8  ;;  %3921 = vmatprep.subr.msk.mxu1 %vm271_vm0, %v4585_v25  ;;  %v2672_v8 = vld [vmem:[%s4056_s21 + $0x36] sm:$0xff] }
 0x129   : > { %3932 = vmatprep.subr.msk.mxu0 %vm271_vm0, %v2392_v9  ;;  %3925 = vmatprep.mubr.msk.f32.mxu1 %vm271_vm0, %v4655_v38  ;;  %v2369_v38 = vld [vmem:[%s4056_s21 + $0x75] sm:$0xff] }
 0x12a   : > { %3936 = vmatprep.mubr.msk.f32.mxu0 %vm271_vm0, %v4784_v0 }
 0x12b   : > { %3922 = vmatpush3.xpose.msk.msra.mxu1 %vm271_vm0, %v4585_v25  ;;  %v2388_v25 = vld [vmem:[%s4056_s21 + $0x10d] sm:$0xff] }
 0x12c   : > { %3933 = vmatpush3.xpose.msk.msra.mxu0 %vm271_vm0, %v2392_v9  ;;  %3923 = vmatprep.subr.msk.mxu1 %vm271_vm0, %v4601_v28  ;;  %v2376_v9 = vld [vmem:[%s4056_s21 + $0xad] sm:$0xff] }
 0x12d   : > { %3934 = vmatprep.subr.msk.mxu0 %vm271_vm0, %v2391_v11 }
 0x12f   : > { %3924 = vmatpush3.xpose.msk.msra.mxu1 %vm271_vm0, %v4601_v28  ;;  %v2683_v28 = vld [vmem:[%s4056_s21 + $0x8e] sm:$0xff] }
 0x130   : > { %3935 = vmatpush3.xpose.msk.msra.mxu0 %vm271_vm0, %v2391_v11  ;;  %3767 = vmatprep.subr.msk.mxu1 %vm271_vm0, %v2390_v14  ;;  %v2360_v11 = vld [vmem:[%s4056_s21 + $0x2d] sm:$0xff] }
 0x131   : > { %3809 = vmatprep.subr.msk.mxu0 %vm271_vm0, %v2701_v15  ;;  %v2686_v14 = vld [vmem:[%s4056_s21 + $0xa6] sm:$0xff] }
 0x132   : > { %3926 = vmatmul.mubr.msk.f32.vlgmr.msra.gmra.mxu1 %vm271_vm0, %v3346_v7  ;;  %v2361_v7 = vld [vmem:[%s4056_s21 + $0x35] sm:$0xff]  ;;  %v2359_v15 = vld [vmem:[%s4056_s21 + $0x25] sm:$0xff] }
 0x133   : > { %3768 = vmatpush3.xpose.msk.msra.mxu1 %vm271_vm0, %v2374_v16  ;;  %3937 = vmatmul.mubr.msk.f32.vlgmr.msra.gmra.mxu0 %vm271_vm0, %v4817_v17  ;;  %v2670_v16 = vld [vmem:[%s4056_s21 + $0x26] sm:$0xff] }
 0x134   : > { %3810 = vmatpush3.xpose.msk.msra.mxu0 %vm271_vm0, %v2685_v18  ;;  %3769 = vmatprep.subr.msk.mxu1 %vm271_vm0, %v2389_v19  ;;  %v2705_v18 = vld [vmem:[%s4056_s21 + $0x13e] sm:$0xff]  ;;  %v2704_v19 = vld [vmem:[%s4056_s21 + $0x136] sm:$0xff] }
 0x135   : > { %3811 = vmatprep.subr.msk.mxu0 %vm271_vm0, %v2700_v21  ;;  %3799 = vmatprep.mubr.msk.f32.mxu1 %vm271_vm0, %v4784_v0  ;;  %v3430_v21 = vld [vmem:[%s5014_s1 + $0x88] sm:$0xf] }
 0x136   : > { %3841 = vmatprep.mubr.msk.f32.mxu0 %vm271_vm0, %v4830_v22 }
 0x137   : > { %3770 = vmatpush3.xpose.msk.msra.mxu1 %vm271_vm0, %v2373_v23  ;;  %v2703_v23 = vld [vmem:[%s4056_s21 + $0x12e] sm:$0xff] }
 0x138   : > { %3812 = vmatpush3.xpose.msk.msra.mxu0 %vm271_vm0, %v2684_v24  ;;  %3771 = vmatprep.subr.msk.mxu1 %vm271_vm0, %v2388_v25  ;;  %v3861_v24 = vpop.f32.mrf.mxu1 }
 0x139   : > { %3813 = vmatprep.subr.msk.mxu0 %vm271_vm0, %v2699_v26 }
 0x13b   : > { %3772 = vmatpush3.xpose.msk.msra.mxu1 %vm271_vm0, %v2372_v27 }
 0x13c   : > { %3814 = vmatpush3.xpose.msk.msra.mxu0 %vm271_vm0, %v2683_v28  ;;  %3773 = vmatprep.subr.msk.mxu1 %vm271_vm0, %v2387_v29  ;;  %v452_v28 = vpop.f32.mrf.mxu0 }
 0x13d   : > { %3815 = vmatprep.subr.msk.mxu0 %vm271_vm0, %v2698_v30 }
 0x13e   : > { %v454_v30 = vpop.f32.mrf.mxu0 }
 0x13f   : > { %3774 = vmatpush3.xpose.msk.msra.mxu1 %vm271_vm0, %v2371_v31 }
 0x140   : > { %3816 = vmatpush3.xpose.msk.msra.mxu0 %vm271_vm0, %v2682_v20  ;;  %3775 = vmatprep.subr.msk.mxu1 %vm271_vm0, %v2386_v32  ;;  %v458_v31 = vpop.f32.mrf.mxu0 }
 0x141   : > { %3817 = vmatprep.subr.msk.mxu0 %vm271_vm0, %v2697_v33 }
 0x142   : > { %v460_v20 = vpop.f32.mrf.mxu0 }
 0x143   : > { %3776 = vmatpush3.xpose.msk.msra.mxu1 %vm271_vm0, %v2370_v34 }
 0x144   : > { %3818 = vmatpush3.xpose.msk.msra.mxu0 %vm271_vm0, %v2681_v35  ;;  %3777 = vmatprep.subr.msk.mxu1 %vm271_vm0, %v2385_v36 }
 0x145   : > { %3819 = vmatprep.subr.msk.mxu0 %vm271_vm0, %v2696_v37 }
 0x147   : > { %3778 = vmatpush3.xpose.msk.msra.mxu1 %vm271_vm0, %v2369_v38 }
 0x148   : > { %3820 = vmatpush3.xpose.msk.msra.mxu0 %vm271_vm0, %v2680_v39  ;;  %3779 = vmatprep.subr.msk.mxu1 %vm271_vm0, %v2384_v40 }
 0x149   : > { %3821 = vmatprep.subr.msk.mxu0 %vm271_vm0, %v2695_v41 }
 0x14b   : > { %3780 = vmatpush3.xpose.msk.msra.mxu1 %vm271_vm0, %v2368_v42 }
 0x14c   : > { %3822 = vmatpush3.xpose.msk.msra.mxu0 %vm271_vm0, %v2679_v43  ;;  %3781 = vmatprep.subr.msk.mxu1 %vm271_vm0, %v2383_v44 }
 0x14d   : > { %3823 = vmatprep.subr.msk.mxu0 %vm271_vm0, %v2694_v45 }
 0x14f   : > { %3782 = vmatpush3.xpose.msk.msra.mxu1 %vm271_vm0, %v2367_v46 }
 0x150   : > { %3824 = vmatpush3.xpose.msk.msra.mxu0 %vm271_vm0, %v2678_v47  ;;  %3783 = vmatprep.subr.msk.mxu1 %vm271_vm0, %v2382_v48 }
 0x151   : > { %3825 = vmatprep.subr.msk.mxu0 %vm271_vm0, %v2693_v49 }
 0x152   : > { %v1023_v33 = vpop.f32.mrf.mxu0 }
 0x153   : > { %3784 = vmatpush3.xpose.msk.msra.mxu1 %vm271_vm0, %v2366_v50 }
 0x154   : > { %3826 = vmatpush3.xpose.msk.msra.mxu0 %vm271_vm0, %v2677_v51  ;;  %3785 = vmatprep.subr.msk.mxu1 %vm271_vm0, %v2381_v52  ;;  %v1025_v35 = vpop.f32.mrf.mxu0 }
 0x155   : > { %3827 = vmatprep.subr.msk.mxu0 %vm271_vm0, %v2692_v53 }
 0x156   : > { %v1029_v38 = vpop.f32.mrf.mxu0 }
 0x157   : > { %3786 = vmatpush3.xpose.msk.msra.mxu1 %vm271_vm0, %v2365_v54 }
 0x158   : > { %3828 = vmatpush3.xpose.msk.msra.mxu0 %vm271_vm0, %v2676_v55  ;;  %3787 = vmatprep.subr.msk.mxu1 %vm271_vm0, %v2380_v56  ;;  %v1031_v40 = vpop.f32.mrf.mxu0 }
 0x159   : > { %3829 = vmatprep.subr.msk.mxu0 %vm271_vm0, %v2691_v57 }
 0x15b   : > { %3788 = vmatpush3.xpose.msk.msra.mxu1 %vm271_vm0, %v2364_v58 }
 0x15c   : > { %3830 = vmatpush3.xpose.msk.msra.mxu0 %vm271_vm0, %v2675_v59  ;;  %3789 = vmatprep.subr.msk.mxu1 %vm271_vm0, %v2379_v60 }
 0x15d   : > { %3831 = vmatprep.subr.msk.mxu0 %vm271_vm0, %v2690_v61 }
 0x15f   : > { %3790 = vmatpush3.xpose.msk.msra.mxu1 %vm271_vm0, %v2363_v62 }
 0x160   : > { %3832 = vmatpush3.xpose.msk.msra.mxu0 %vm271_vm0, %v2674_v63  ;;  %3791 = vmatprep.subr.msk.mxu1 %vm271_vm0, %v2378_v1 }
 0x161   : > { %3833 = vmatprep.subr.msk.mxu0 %vm271_vm0, %v2689_v2 }
 0x163   : > { %3792 = vmatpush3.xpose.msk.msra.mxu1 %vm271_vm0, %v2362_v3 }
 0x164   : > { %3834 = vmatpush3.xpose.msk.msra.mxu0 %vm271_vm0, %v2673_v4  ;;  %3793 = vmatprep.subr.msk.mxu1 %vm271_vm0, %v2377_v5 }
 0x165   : > { %3835 = vmatprep.subr.msk.mxu0 %vm271_vm0, %v2688_v6 }
 0x167   : > { %3794 = vmatpush3.xpose.msk.msra.mxu1 %vm271_vm0, %v2361_v7 }
 0x168   : > { %3836 = vmatpush3.xpose.msk.msra.mxu0 %vm271_vm0, %v2672_v8  ;;  %3795 = vmatprep.subr.msk.mxu1 %vm271_vm0, %v2376_v9 }
 0x169   : > { %3837 = vmatprep.subr.msk.mxu0 %vm271_vm0, %v2687_v10 }
 0x16b   : > { %3796 = vmatpush3.xpose.msk.msra.mxu1 %vm271_vm0, %v2360_v11 }
 0x16c   : > { %3838 = vmatpush3.xpose.msk.msra.mxu0 %vm271_vm0, %v2671_v12  ;;  %3797 = vmatprep.subr.msk.mxu1 %vm271_vm0, %v2375_v13 }
 0x16d   : > { %3839 = vmatprep.subr.msk.mxu0 %vm271_vm0, %v2686_v14 }
 0x16f   : > { %3798 = vmatpush3.xpose.msk.msra.mxu1 %vm271_vm0, %v2359_v15 }
 0x170   : > { %3840 = vmatpush3.xpose.msk.msra.mxu0 %vm271_vm0, %v2670_v16  ;;  %3939 = vmatprep.subr.msk.mxu1 %vm271_vm0, %v2705_v18 }
 0x172   : > { %3800 = vmatmul.mubr.msk.f32.vlgmr.msra.gmra.mxu1 %vm271_vm0, %v4784_v0  ;;  %v2702_v0 = vld [vmem:[%s4056_s21 + $0x126] sm:$0xff]  ;;  %s3951_s21 = smul.u32 48, %s5022_s12 }
 0x173   : > { %3940 = vmatpush3.xpose.msk.msra.mxu1 %vm271_vm0, %v2705_v18  ;;  %3842 = vmatmul.mubr.msk.f32.vlgmr.msra.gmra.mxu0 %vm271_vm0, %v4830_v22 }
 0x174   : > { %3801 = vmatprep.mubr.msk.f32.mxu1 %vm271_vm0, %v4817_v17  ;;  %3941 = vmatprep.subr.msk.mxu1 %vm271_vm0, %v2704_v19  ;;  %s4994_s17 = scalar_lea.vmem %s5016_s3, %s3951_s21 }
 0x175   : > { %3843 = vmatprep.mubr.msk.f32.mxu0 %vm271_vm0, %v3430_v21 }
 0x176   : > { %3802 = vmatmul.mubr.msk.f32.gmra.mxu1 %vm271_vm0, %v4817_v17  ;;  %v4983_v17 = vpop.f32.mrf.mxu1 }
 0x177   : > { %3942 = vmatpush3.xpose.msk.msra.mxu1 %vm271_vm0, %v2704_v19  ;;  %3844 = vmatmul.mubr.msk.f32.gmra.mxu0 %vm271_vm0, %v3430_v21 }
 0x178   : > { %3943 = vmatprep.subr.msk.mxu1 %vm271_vm0, %v2703_v23  ;;  %3947 = vmatprep.mubr.msk.f32.mxu1 %vm271_vm0, %v4830_v22  ;;  %v718_v25 = vpop.f32.mrf.mxu1 }
 0x179   : > { %v719_v57 = vadd.f32 %v718_v25, %v452_v28 }
 0x17a   : > { %v720_v26 = vpop.f32.mrf.mxu1 }
 0x17b   : > { %3944 = vmatpush3.xpose.msk.msra.mxu1 %vm271_vm0, %v2703_v23  ;;  %v721_v59 = vadd.f32 %v720_v26, %v454_v30  ;;  %v1109_v60 = vadd.f32 %v1023_v33, %v719_v57 }
 0x17c   : > { %3945 = vmatprep.subr.msk.mxu1 %vm271_vm0, %v2702_v0  ;;  %v724_v27 = vpop.f32.mrf.mxu1 }
 0x17d   : > { %v725_v62 = vadd.f32 %v724_v27, %v458_v31  ;;  %v1110_v63 = vadd.f32 %v1025_v35, %v721_v59 }
 0x17e   : > { %v726_v29 = vpop.f32.mrf.mxu1 }
 0x17f   : > { %3946 = vmatpush3.xpose.msk.msra.mxu1 %vm271_vm0, %v2702_v0  ;;  %v727_v3 = vadd.f32 %v726_v29, %v460_v20  ;;  %v1112_v4 = vadd.f32 %v1029_v38, %v725_v62  ;;  %v2986_v29 = vpop.permute.xlu0 %2985 }
 0x180   : > { %v3872_v22 = vpop.f32.mrf.mxu1 }
 0x181   : > { %v1113_v9 = vadd.f32 %v1031_v40, %v727_v3  ;;  %v801_v18 = vadd.f32 %v3872_v22, %v3861_v24 }
 0x182   : > { %3948 = vmatmul.mubr.msk.f32.vlgmr.msra.gmra.mxu1 %vm271_vm0, %v3430_v21  ;;  %v795_v32 = vpop.f32.mrf.mxu1 }
 0x183   : > { %v796_v26 = vadd.f32 %v795_v32, %v4983_v17 }
 0x184   : > { %v3883_v34 = vpop.f32.mrf.mxu1 }
 0x185   : > { %v1114_v27 = vadd.f32 %v3883_v34, %v801_v18 }
 0x186   : > { %v1100_v36 = vpop.f32.mrf.mxu1 }
 0x187   : > { %v1111_v35 = vadd.f32 %v1100_v36, %v796_v26 }
 0x188   : > { %v1334_v37 = vpop.f32.mrf.mxu1 }
 0x189   : > { %v1420_v1 = vadd.f32 %v1334_v37, %v1109_v60 }
 0x18a   : > { %v1336_v39 = vpop.f32.mrf.mxu1 }
 0x18b   : > { %v1421_v5 = vadd.f32 %v1336_v39, %v1110_v63 }
 0x18c   : > { %v1340_v42 = vpop.f32.mrf.mxu1 }
 0x18d   : > { %v1423_v10 = vadd.f32 %v1340_v42, %v1112_v4 }
 0x18e   : > { %v1342_v44 = vpop.f32.mrf.mxu1 }
 0x18f   : > { %v1424_v14 = vadd.f32 %v1342_v44, %v1113_v9 }
 0x192   : > { %v1645_v41 = vpop.f32.mrf.mxu0  ;;  %v3894_v45 = vpop.f32.mrf.mxu1 }
 0x193   : > { %v1731_v6 = vadd.f32 %v1645_v41, %v1420_v1  ;;  %v1425_v37 = vadd.f32 %v3894_v45, %v1114_v27 }
 0x194   : > { %v1647_v43 = vpop.f32.mrf.mxu0  ;;  %v1411_v47 = vpop.f32.mrf.mxu1 }
 0x195   : > { %v1732_v11 = vadd.f32 %v1647_v43, %v1421_v5  ;;  %v1422_v41 = vadd.f32 %v1411_v47, %v1111_v35 }
 0x196   : > { %v1651_v46 = vpop.f32.mrf.mxu0 }
 0x197   : > { %v1734_v15 = vadd.f32 %v1651_v46, %v1423_v10  ;;  %v2991_v46 = vpop.permute.xlu0 %2990 }
 0x198   : > { %v1653_v48 = vpop.f32.mrf.mxu0 }
 0x199   : > { %v1735_v21 = vadd.f32 %v1653_v48, %v1424_v14 }
 0x1a2   : > { %v3905_v49 = vpop.f32.mrf.mxu1 }
 0x1a3   : > { %v4985_v50 = vpop.f32.mrf.mxu0  ;;  %v1736_v42 = vadd.f32 %v3905_v49, %v1425_v37 }
 0x1a4   : > { %v1722_v51 = vpop.f32.mrf.mxu1 }
 0x1a5   : > { %v4987_v52 = vpop.f32.mrf.mxu0  ;;  %v1733_v48 = vadd.f32 %v1722_v51, %v1422_v41 }
 0x1e2   : > { %v1956_v53 = vpop.f32.mrf.mxu1 }
 0x1e3   : > { %v2267_v54 = vpop.f32.mrf.mxu0  ;;  %v2042_v12 = vadd.f32 %v1956_v53, %v1731_v6 }
 0x1e4   : > { %v1958_v55 = vpop.f32.mrf.mxu1 }
 0x1e5   : > { %v2269_v56 = vpop.f32.mrf.mxu0  ;;  %v2043_v16 = vadd.f32 %v1958_v55, %v1732_v11  ;;  %v2353_v23 = vadd.f32 %v2267_v54, %v2042_v12  ;;  %v2047_v55 = vadd.f32 %v4985_v50, %v1736_v42 }
 0x1e6   : > { %v1962_v58 = vpop.f32.mrf.mxu1 }
 0x1e7   : > { %v2273_v61 = vpop.f32.mrf.mxu0  ;;  %v2045_v0 = vadd.f32 %v1962_v58, %v1734_v15  ;;  %v2354_v30 = vadd.f32 %v2269_v56, %v2043_v16  ;;  %v2044_v58 = vadd.f32 %v4987_v52, %v1733_v48 }
 0x1e8   : > { %v1964_v2 = vpop.f32.mrf.mxu1 }
 0x1e9   : > { %v2275_v7 = vpop.f32.mrf.mxu0  ;;  %v2046_v31 = vadd.f32 %v1964_v2, %v1735_v21  ;;  %v2356_v39 = vadd.f32 %v2273_v61, %v2045_v0 }
 0x1eb   : > { %v2357_v32 = vadd.f32 %v2275_v7, %v2046_v31 }
 0x1f2   : > { %v3927_v8 = vpop.f32.mrf.mxu1 }
 0x1f3   : > { %v3938_v13 = vpop.f32.mrf.mxu0  ;;  %v2358_v59 = vadd.f32 %v3927_v8, %v2047_v55 }
 0x1f4   : > { %v2344_v19 = vpop.f32.mrf.mxu1 }
 0x1f5   : > { %v2655_v25 = vpop.f32.mrf.mxu0  ;;  %v2355_v61 = vadd.f32 %v2344_v19, %v2044_v58  ;;  %v2669_v51 = vadd.f32 %v3938_v13, %v2358_v59 }
 0x1f7   : > { %v2666_v63 = vadd.f32 %v2655_v25, %v2355_v61 }
 0x232   : > { %v2578_v28 = vpop.f32.mrf.mxu1 }
 0x233   : > { %v2664_v20 = vadd.f32 %v2578_v28, %v2353_v23  ;;  %v2889_v33 = vpop.f32.mrf.mxu0 }
 0x234   : > { %v2580_v38 = vpop.f32.mrf.mxu1 }
 0x235   : > { %v2665_v24 = vadd.f32 %v2580_v38, %v2354_v30  ;;  %v2975_v22 = vadd.f32 %v2889_v33, %v2664_v20  ;;  %v2891_v40 = vpop.f32.mrf.mxu0 }
 0x236   : > { %v2584_v17 = vpop.f32.mrf.mxu1 }
 0x237   : > { %v2993_v34 = vadd.f32 %v2986_v29, %v2975_v22  ;;  %v2667_v43 = vadd.f32 %v2584_v17, %v2356_v39  ;;  %v2976_v36 = vadd.f32 %v2891_v40, %v2665_v24  ;;  %v2895_v44 = vpop.f32.mrf.mxu0 }
 0x238   : > { %v2586_v45 = vpop.f32.mrf.mxu1 }
 0x239   : > { %2999 = vst [vmem:[%s4994_s17] sm:$0xff] %v2993_v34  ;;  %v2994_v47 = vadd.f32 %v2986_v29, %v2976_v36  ;;  %v2668_v49 = vadd.f32 %v2586_v45, %v2357_v32  ;;  %v2978_v53 = vadd.f32 %v2895_v44, %v2667_v43  ;;  %v2897_v54 = vpop.f32.mrf.mxu0 }
 0x23b   : > { %3000 = vst [vmem:[%s4994_s17 + $0x8] sm:$0xff] %v2994_v47  ;;  %v2996_v56 = vadd.f32 %v2991_v46, %v2978_v53  ;;  %v2979_v57 = vadd.f32 %v2897_v54, %v2668_v49 }
 0x23d   : > { %3003 = vst [vmem:[%s4994_s17 + $0x18] sm:$0xf] %v2996_v56  ;;  %v2997_v60 = vadd.f32 %v2991_v46, %v2979_v57 }
 0x23f   : > { %3004 = vst [vmem:[%s4994_s17 + $0x20] sm:$0xf] %v2997_v60 }
 0x242   : > { %v3949_v62 = vpop.f32.mrf.mxu1 }
 0x243   : > { %v2980_v1 = vadd.f32 %v3949_v62, %v2669_v51 }
 0x244   : > { %v2966_v2 = vpop.f32.mrf.mxu1 }
 0x245   : > { %v2998_v3 = vadd.f32 %v2991_v46, %v2980_v1  ;;  %v2977_v50 = vadd.f32 %v2966_v2, %v2666_v63 }
 0x247   : > { %3006 = vst.msk [vmem:[%s4994_s17 + $0x28] sm:$0xf] %vm3005_vm1, %v2998_v3  ;;  %v2995_v4 = vadd.f32 %v2986_v29, %v2977_v50 }
 0x249   : > { %3002 = vst.msk [vmem:[%s4994_s17 + $0x10] sm:$0xff] %vm3001_vm2, %v2995_v4 }
 0x24a PF: > { %s13_s14 = sadd.s32 1, %s4000_s14   ;;  %s5017_s12 = smov %s3996_s13 }
 0x24b   : > { %p10_p5 = scmp.ge.s32.totalorder %s13_s14, 4   ;;  %s5018_s13 = smov %s5020_s15 }
 0x24d   :  { %12 = sbr.rel (!%p10_p5) target bundleno = 2 (0x2), region = 70 }

</bundles_post_ra>
